<compile_context>
chip_gen: v7x
topology: tpu7x:2x2x1
jax: 0.10.0
libtpu: 0.0.40
codegen_flags: <defaults>
</compile_context>

<pallas_src>
import functools
import math

import jax
import jax.numpy as jnp
from jax import lax
from jax.experimental import pallas as pl
from jax.experimental.pallas import tpu as pltpu

_ACT_DTYPE = jnp.bfloat16                    # activation / weight compute dtype
_VMEM_LIMIT = 48 * 1024 * 1024               # under v7x's 64 MiB physical VMEM


def _pick_tile(n, candidates):
    """Largest candidate tile that evenly divides n, else the full extent."""
    for c in candidates:
        if c <= n and n % c == 0:
            return c
    return n


# -----------------------------------------------------------------------------
# Fused linear kernel: [LayerNorm] -> x @ w + b -> [GELU] -> [+ residual]
# -----------------------------------------------------------------------------
def _make_linear_kernel(*, nk, activation, fuse_ln, fuse_res, eps):
    def kernel(x_ref, w_ref, b_ref, *rest):
        pos = 0
        if fuse_ln:
            ln_s_ref, ln_b_ref = rest[0], rest[1]
            pos = 2
        if fuse_res:
            res_ref = rest[pos]
            pos += 1
        o_ref = rest[pos]
        acc_ref = rest[pos + 1] if nk > 1 else None

        x = x_ref[...]
        if fuse_ln:
            # LayerNorm stats in f32 over the full feature dim (nk == 1 here).
            xf = x.astype(jnp.float32)
            mean = jnp.mean(xf, axis=-1, keepdims=True)
            var = jnp.mean(jnp.square(xf - mean), axis=-1, keepdims=True)
            x = ln_s_ref[...] * ((xf - mean) * lax.rsqrt(var + eps)) + ln_b_ref[...]
        x = x.astype(w_ref.dtype)                          # bf16 MXU input

        def epilogue(acc):
            y = acc + b_ref[...].astype(jnp.float32)
            if activation == "gelu":
                c = math.sqrt(2.0 / math.pi)               # tanh-GELU (matches spec)
                y = 0.5 * y * (1.0 + jnp.tanh(c * (y + 0.044715 * y * y * y)))
            if fuse_res:
                y = y + res_ref[...].astype(jnp.float32)
            return y.astype(o_ref.dtype)

        if nk == 1:
            acc = jnp.dot(x, w_ref[...], preferred_element_type=jnp.float32)
            o_ref[...] = epilogue(acc)
        else:
            k = pl.program_id(2)

            @pl.when(k == 0)
            def _():
                acc_ref[...] = jnp.zeros_like(acc_ref)

            acc_ref[...] += jnp.dot(x, w_ref[...],
                                    preferred_element_type=jnp.float32)

            @pl.when(k == nk - 1)
            def _():
                o_ref[...] = epilogue(acc_ref[...])

    return kernel


def fused_linear(x2d, w, b, *, ln=None, residual=None, activation=None,
                 out_dtype=None, eps=1e-5):
    """y = [GELU]([LN](x) @ w + b) [+ residual], tiled over (rows, cols, K)."""
    N, Din = x2d.shape
    Dout = w.shape[1]
    out_dtype = out_dtype if out_dtype is not None else x2d.dtype
    fuse_ln = ln is not None
    fuse_res = residual is not None

    tm = _pick_tile(N, (512, 256, 128, 64, 32, 16, 8))
    tn = _pick_tile(Dout, (512, 384, 256, 128))
    # LayerNorm needs the full feature dim in one block; otherwise tile K.
    tk = Din if fuse_ln else _pick_tile(Din, (1536, 1024, 768, 512, 384, 256, 128))
    nm, nn, nk = N // tm, Dout // tn, Din // tk
    assert nm * tm == N and nn * tn == Dout and nk * tk == Din

    kernel = _make_linear_kernel(nk=nk, activation=activation,
                                 fuse_ln=fuse_ln, fuse_res=fuse_res, eps=eps)

    if nk == 1:
        grid = (nm, nn)
        x_map = lambda i, j: (i, 0)
        w_map = lambda i, j: (0, j)
        b_map = lambda i, j: (0, j)
        o_map = lambda i, j: (i, j)
        ln_map = lambda i, j: (0, 0)
        semantics = ("parallel", "parallel")
        scratch = []
    else:
        grid = (nm, nn, nk)
        x_map = lambda i, j, k: (i, k)
        w_map = lambda i, j, k: (k, j)
        b_map = lambda i, j, k: (0, j)
        o_map = lambda i, j, k: (i, j)
        ln_map = lambda i, j, k: (0, 0)
        semantics = ("parallel", "parallel", "arbitrary")
        scratch = [pltpu.VMEM((tm, tn), jnp.float32)]

    inputs = [x2d, w, b.reshape(1, Dout).astype(jnp.float32)]
    in_specs = [pl.BlockSpec((tm, tk), x_map),
                pl.BlockSpec((tk, tn), w_map),
                pl.BlockSpec((1, tn), b_map)]
    if fuse_ln:
        scale, shift = ln
        inputs += [scale.reshape(1, Din).astype(jnp.float32),
                   shift.reshape(1, Din).astype(jnp.float32)]
        in_specs += [pl.BlockSpec((1, Din), ln_map),
                     pl.BlockSpec((1, Din), ln_map)]
    if fuse_res:
        inputs.append(residual)
        in_specs.append(pl.BlockSpec((tm, tn), o_map))

    return pl.pallas_call(
        kernel,
        out_shape=jax.ShapeDtypeStruct((N, Dout), out_dtype),
        grid=grid,
        in_specs=in_specs,
        out_specs=pl.BlockSpec((tm, tn), o_map),
        scratch_shapes=scratch,
        compiler_params=pltpu.CompilerParams(
            dimension_semantics=semantics,
            vmem_limit_bytes=_VMEM_LIMIT),
    )(*inputs)


# -----------------------------------------------------------------------------
# Causal multi-head attention, consuming the fused QKV activation directly
# -----------------------------------------------------------------------------
def _make_attn_kernel(*, n_heads, head_dim, scale):
    def kernel(qkv_ref, o_ref):
        qkv = qkv_ref[...]                           # (T, 3*D), one batch elem
        T = qkv.shape[0]
        D = n_heads * head_dim
        row = lax.broadcasted_iota(jnp.int32, (T, T), 0)
        col = lax.broadcasted_iota(jnp.int32, (T, T), 1)
        causal = col > row
        outs = []
        for h in range(n_heads):
            lo = h * head_dim
            # fold 1/sqrt(hd) into q (T*hd muls instead of T*T on the scores)
            q = (qkv[:, lo:lo + head_dim].astype(jnp.float32)
                 * scale).astype(qkv.dtype)
            k = qkv[:, D + lo:D + lo + head_dim]
            v = qkv[:, 2 * D + lo:2 * D + lo + head_dim]
            # q . k^T without materializing a transposed copy
            s = lax.dot_general(q, k, (((1,), (1,)), ((), ())),
                                preferred_element_type=jnp.float32)   # (T, T)
            s = jnp.where(causal, -1e30, s)
            m = jnp.max(s, axis=-1, keepdims=True)
            p = jnp.exp(s - m)
            l = jnp.sum(p, axis=-1, keepdims=True)
            ctx = jnp.dot(p.astype(v.dtype), v,
                          preferred_element_type=jnp.float32)         # (T, hd)
            outs.append(ctx * pl.reciprocal(l, approx=True))
        # single lane-dense (T, D) store
        o_ref[...] = jnp.concatenate(outs, axis=-1).astype(o_ref.dtype)

    return kernel


def causal_attention(qkv, *, n_heads):
    """qkv: [B, T, 3*D] fused q|k|v activations (heads contiguous inside each)."""
    B, T, D3 = qkv.shape
    D = D3 // 3
    hd = D // n_heads
    kernel = _make_attn_kernel(n_heads=n_heads, head_dim=hd,
                               scale=1.0 / math.sqrt(hd))
    # TODO(synk): for long contexts (T >= ~1024) replace the monolithic (T, T)
    # score tile with a KV-tiled flash-attention kernel (online softmax m/l/acc
    # scratch) so it fits v7x's 64 MiB VMEM and masked KV blocks can be skipped.
    return pl.pallas_call(
        kernel,
        out_shape=jax.ShapeDtypeStruct((B, T, D), qkv.dtype),
        grid=(B,),
        in_specs=[pl.BlockSpec((None, T, D3), lambda b: (b, 0, 0))],
        out_specs=pl.BlockSpec((None, T, D), lambda b: (b, 0, 0)),
        compiler_params=pltpu.CompilerParams(
            dimension_semantics=("parallel",),
            vmem_limit_bytes=_VMEM_LIMIT),
    )(qkv)


# -----------------------------------------------------------------------------
# Parameter init (deterministic, synthetic)
# -----------------------------------------------------------------------------
def init_params(key, config):
    D = config["emb_dim"]
    V = config["vocab_size"]
    C = config["context_length"]
    F = 4 * D

    def dense(k, shape):
        return 0.02 * jax.random.normal(k, shape, dtype=jnp.float32)

    keys = jax.random.split(key, 3 + config["n_layers"])
    params = {
        "tok_emb": dense(keys[0], (V, D)),
        "pos_emb": dense(keys[1], (C, D)),
        "w_head": dense(keys[2], (D, V)).astype(_ACT_DTYPE),
        "lnf_s": jnp.ones((D,), jnp.float32),
        "lnf_b": jnp.zeros((D,), jnp.float32),
        "blocks": [],
    }
    for l in range(config["n_layers"]):
        ks = jax.random.split(keys[3 + l], 6)
        wq = dense(ks[0], (D, D))
        wk = dense(ks[1], (D, D))
        wv = dense(ks[2], (D, D))
        blk = {
            "ln1_s": jnp.ones((D,), jnp.float32),
            "ln1_b": jnp.zeros((D,), jnp.float32),
            "ln2_s": jnp.ones((D,), jnp.float32),
            "ln2_b": jnp.zeros((D,), jnp.float32),
            # fused QKV projection: columns laid out as [ q | k | v ]
            "w_qkv": jnp.concatenate([wq, wk, wv], axis=1).astype(_ACT_DTYPE),
            "b_qkv": jnp.zeros((3 * D,), jnp.float32),
            "wo": dense(ks[3], (D, D)).astype(_ACT_DTYPE),
            "bo": jnp.zeros((D,), jnp.float32),
            "w1": dense(ks[4], (D, F)).astype(_ACT_DTYPE),
            "b1": jnp.zeros((F,), jnp.float32),
            "w2": dense(ks[5], (F, D)).astype(_ACT_DTYPE),
            "b2": jnp.zeros((D,), jnp.float32),
        }
        params["blocks"].append(blk)
    return params


# -----------------------------------------------------------------------------
# Full GPT-2 forward
# -----------------------------------------------------------------------------
def gpt2_forward(params, tokens, config):
    B, T = tokens.shape
    D = config["emb_dim"]
    H = config["n_heads"]
    V = config["vocab_size"]

    # token + position embeddings (plain-JAX gather; dropout p=0 is identity)
    x = params["tok_emb"][tokens] + params["pos_emb"][:T][None, :, :]
    x2 = x.reshape(B * T, D).astype(_ACT_DTYPE)

    for blk in params["blocks"]:
        # --- attention sub-block: LN1 + fused QKV projection in one kernel ---
        qkv = fused_linear(x2, blk["w_qkv"], blk["b_qkv"],
                           ln=(blk["ln1_s"], blk["ln1_b"]))            # [N, 3D]
        ctx = causal_attention(qkv.reshape(B, T, 3 * D), n_heads=H)    # [B, T, D]
        # output projection with the residual add fused into the epilogue
        x2 = fused_linear(ctx.reshape(B * T, D), blk["wo"], blk["bo"],
                          residual=x2)

        # --- feed-forward sub-block: LN2 + W1 + GELU fused, then W2 + residual
        h = fused_linear(x2, blk["w1"], blk["b1"],
                         ln=(blk["ln2_s"], blk["ln2_b"]), activation="gelu")
        x2 = fused_linear(h, blk["w2"], blk["b2"], residual=x2)

    # final LayerNorm fused into the (bias-free) lm head; logits in f32
    zero_bias = jnp.zeros((V,), jnp.float32)
    logits = fused_linear(x2, params["w_head"], zero_bias,
                          ln=(params["lnf_s"], params["lnf_b"]),
                          out_dtype=jnp.float32)
    return logits.reshape(B, T, V)


# -----------------------------------------------------------------------------
if __name__ == "__main__":
    config = {
        "vocab_size": 128,
        "context_length": 8,
        "emb_dim": 32,
        "n_heads": 4,
        "n_layers": 2,
        "drop_rate": 0.0,     # dropout is identity in this synthetic forward
        "qkv_bias": True,
    }
    B, T = 2, 8

    key = jax.random.PRNGKey(0)
    pkey, tkey = jax.random.split(key)
    params = init_params(pkey, config)
    tokens = jax.random.randint(tkey, (B, T), 0, config["vocab_size"],
                                dtype=jnp.int32)

    fwd = jax.jit(functools.partial(gpt2_forward, config=config))
    logits = fwd(params, tokens)
    logits = jax.block_until_ready(logits)

    assert logits.shape == (B, T, config["vocab_size"])
    assert bool(jnp.all(jnp.isfinite(logits)))
    print("KERNEL_OK")
</pallas_src>

<mosaic_0001>
module attributes {stable_mosaic.version = 11 : i64} {
  func.func @kernel(%arg0: i32, %arg1: i32, %arg2: memref<16x32xbf16, #tpu.memory_space<vmem>>, %arg3: memref<32x96xbf16, #tpu.memory_space<vmem>>, %arg4: memref<1x96xf32, #tpu.memory_space<vmem>>, %arg5: memref<1x32xf32, #tpu.memory_space<vmem>>, %arg6: memref<1x32xf32, #tpu.memory_space<vmem>>, %arg7: memref<16x96xbf16, #tpu.memory_space<vmem>>) attributes {dimension_semantics = [#tpu.dimension_semantics<parallel>, #tpu.dimension_semantics<parallel>], iteration_bounds = array<i64: 1, 1>, scalar_prefetch = 0 : i64, scratch_operands = 0 : i64, tpu.core_type = #tpu.core_type<tc>, window_params = [{transform_indices = @transform_0, window_bounds = array<i64: 16, 32>}, {transform_indices = @transform_1, window_bounds = array<i64: 32, 96>}, {transform_indices = @transform_2, window_bounds = array<i64: 1, 96>}, {pipeline_mode = #tpu.pipeline_mode<synchronous>, transform_indices = @transform_3, window_bounds = array<i64: 1, 32>}, {pipeline_mode = #tpu.pipeline_mode<synchronous>, transform_indices = @transform_4, window_bounds = array<i64: 1, 32>}, {transform_indices = @transform_5, window_bounds = array<i64: 16, 96>}]} {
    %c0 = arith.constant 0 : index
    %c0_0 = arith.constant 0 : index
    %0 = vector.load %arg2[%c0, %c0_0] : memref<16x32xbf16, #tpu.memory_space<vmem>>, vector<16x32xbf16>
    %1 = arith.extf %0 : vector<16x32xbf16> to vector<16x32xf32>
    %cst = arith.constant dense<0.000000e+00> : vector<16xf32>
    %2 = vector.multi_reduction <add>, %1, %cst [1] : vector<16x32xf32> to vector<16xf32>
    %3 = vector.shape_cast %2 : vector<16xf32> to vector<16x1xf32>
    %cst_1 = arith.constant 3.200000e+01 : f32
    %4 = vector.broadcast %cst_1 : f32 to vector<16x1xf32>
    %5 = arith.divf %3, %4 : vector<16x1xf32>
    %6 = vector.broadcast %5 : vector<16x1xf32> to vector<16x32xf32>
    %7 = arith.subf %1, %6 : vector<16x32xf32>
    %8 = arith.mulf %7, %7 : vector<16x32xf32>
    %cst_2 = arith.constant dense<0.000000e+00> : vector<16xf32>
    %9 = vector.multi_reduction <add>, %8, %cst_2 [1] : vector<16x32xf32> to vector<16xf32>
    %10 = vector.shape_cast %9 : vector<16xf32> to vector<16x1xf32>
    %cst_3 = arith.constant 3.200000e+01 : f32
    %11 = vector.broadcast %cst_3 : f32 to vector<16x1xf32>
    %12 = arith.divf %10, %11 : vector<16x1xf32>
    %c0_4 = arith.constant 0 : index
    %c0_5 = arith.constant 0 : index
    %13 = vector.load %arg5[%c0_4, %c0_5] : memref<1x32xf32, #tpu.memory_space<vmem>>, vector<1x32xf32>
    %14 = vector.broadcast %5 : vector<16x1xf32> to vector<16x32xf32>
    %15 = arith.subf %1, %14 : vector<16x32xf32>
    %cst_6 = arith.constant 9.99999974E-6 : f32
    %16 = vector.broadcast %cst_6 : f32 to vector<16x1xf32>
    %17 = arith.addf %12, %16 : vector<16x1xf32>
    %18 = math.rsqrt %17 : vector<16x1xf32>
    %19 = vector.broadcast %18 : vector<16x1xf32> to vector<16x32xf32>
    %20 = arith.mulf %15, %19 : vector<16x32xf32>
    %21 = vector.broadcast %13 : vector<1x32xf32> to vector<16x32xf32>
    %22 = arith.mulf %21, %20 : vector<16x32xf32>
    %c0_7 = arith.constant 0 : index
    %c0_8 = arith.constant 0 : index
    %23 = vector.load %arg6[%c0_7, %c0_8] : memref<1x32xf32, #tpu.memory_space<vmem>>, vector<1x32xf32>
    %24 = vector.broadcast %23 : vector<1x32xf32> to vector<16x32xf32>
    %25 = arith.addf %22, %24 : vector<16x32xf32>
    %26 = arith.truncf %25 : vector<16x32xf32> to vector<16x32xbf16>
    %c0_9 = arith.constant 0 : index
    %c0_10 = arith.constant 0 : index
    %27 = vector.load %arg3[%c0_9, %c0_10] : memref<32x96xbf16, #tpu.memory_space<vmem>>, vector<32x96xbf16>
    %cst_11 = arith.constant dense<0.000000e+00> : vector<16x96xf32>
    %28 = tpu.matmul %26, %27, %cst_11 {dimension_numbers = #tpu.dot_dimension_numbers<[1], [0], [0], [1], [0, 0, 1, 1], [], []>} : vector<16x32xbf16>, vector<32x96xbf16>, vector<16x96xf32> -> vector<16x96xf32>
    %c0_12 = arith.constant 0 : index
    %c0_13 = arith.constant 0 : index
    %29 = vector.load %arg4[%c0_12, %c0_13] : memref<1x96xf32, #tpu.memory_space<vmem>>, vector<1x96xf32>
    %30 = vector.broadcast %29 : vector<1x96xf32> to vector<16x96xf32>
    %31 = arith.addf %28, %30 : vector<16x96xf32>
    %32 = arith.truncf %31 : vector<16x96xf32> to vector<16x96xbf16>
    %c0_14 = arith.constant 0 : index
    %c0_15 = arith.constant 0 : index
    %33 = vector.load %arg7[%c0_14, %c0_15] : memref<16x96xbf16, #tpu.memory_space<vmem>>, vector<16x96xbf16>
    tpu.vector_store %arg7[%c0_14, %c0_15], %32 {strides = array<i32>} : memref<16x96xbf16, #tpu.memory_space<vmem>>, vector<16x96xbf16>,
    return
  }
  func.func @transform_0(%arg0: i32, %arg1: i32) -> (i32, i32) {
    %c0_i32 = arith.constant 0 : i32
    %c0_i32_0 = arith.constant 0 : i32
    return %arg0, %c0_i32 : i32, i32
  }
  func.func @transform_1(%arg0: i32, %arg1: i32) -> (i32, i32) {
    %c0_i32 = arith.constant 0 : i32
    %c0_i32_0 = arith.constant 0 : i32
    return %c0_i32, %arg1 : i32, i32
  }
  func.func @transform_2(%arg0: i32, %arg1: i32) -> (i32, i32) {
    %c0_i32 = arith.constant 0 : i32
    %c0_i32_0 = arith.constant 0 : i32
    return %c0_i32, %arg1 : i32, i32
  }
  func.func @transform_3(%arg0: i32, %arg1: i32) -> (i32, i32) {
    %c0_i32 = arith.constant 0 : i32
    %c0_i32_0 = arith.constant 0 : i32
    %c0_i32_1 = arith.constant 0 : i32
    return %c0_i32, %c0_i32_0 : i32, i32
  }
  func.func @transform_4(%arg0: i32, %arg1: i32) -> (i32, i32) {
    %c0_i32 = arith.constant 0 : i32
    %c0_i32_0 = arith.constant 0 : i32
    %c0_i32_1 = arith.constant 0 : i32
    return %c0_i32, %c0_i32_0 : i32, i32
  }
  func.func @transform_5(%arg0: i32, %arg1: i32) -> (i32, i32) {
    %c0_i32 = arith.constant 0 : i32
    return %arg0, %arg1 : i32, i32
  }
}

module attributes {stable_mosaic.version = 11 : i64} {
  func.func @kernel(%arg0: i32, %arg1: memref<1x8x96xbf16, #tpu.memory_space<vmem>>, %arg2: memref<1x8x32xbf16, #tpu.memory_space<vmem>>) attributes {dimension_semantics = [#tpu.dimension_semantics<parallel>], iteration_bounds = array<i64: 2>, scalar_prefetch = 0 : i64, scratch_operands = 0 : i64, tpu.core_type = #tpu.core_type<tc>, window_params = [{transform_indices = @transform_0, window_bounds = array<i64: 1, 8, 96>}, {transform_indices = @transform_1, window_bounds = array<i64: 1, 8, 32>}]} {
    %c0 = arith.constant 0 : index
    %c0_0 = arith.constant 0 : index
    %c0_1 = arith.constant 0 : index
    %0 = vector.load %arg1[%c0, %c0_0, %c0_1] : memref<1x8x96xbf16, #tpu.memory_space<vmem>>, vector<1x8x96xbf16>
    %1 = vector.shape_cast %0 : vector<1x8x96xbf16> to vector<8x96xbf16>
    %2 = tpu.iota {dimensions = array<i32: 0>} : vector<8x8xi32>
    %3 = tpu.iota {dimensions = array<i32: 1>} : vector<8x8xi32>
    %4 = arith.cmpi sgt, %3, %2 : vector<8x8xi32>
    %5 = vector.extract_strided_slice %1 {offsets = [0, 0], sizes = [8, 8], strides = [1, 1]} : vector<8x96xbf16> to vector<8x8xbf16>
    %6 = arith.extf %5 : vector<8x8xbf16> to vector<8x8xf32>
    %cst = arith.constant 0.353553385 : f32
    %7 = vector.broadcast %cst : f32 to vector<8x8xf32>
    %8 = arith.mulf %6, %7 : vector<8x8xf32>
    %9 = arith.truncf %8 : vector<8x8xf32> to vector<8x8xbf16>
    %10 = vector.extract_strided_slice %1 {offsets = [0, 32], sizes = [8, 8], strides = [1, 1]} : vector<8x96xbf16> to vector<8x8xbf16>
    %11 = vector.extract_strided_slice %1 {offsets = [0, 64], sizes = [8, 8], strides = [1, 1]} : vector<8x96xbf16> to vector<8x8xbf16>
    %cst_2 = arith.constant dense<0.000000e+00> : vector<8x8xf32>
    %12 = tpu.matmul %9, %10, %cst_2 {dimension_numbers = #tpu.dot_dimension_numbers<[1], [1], [0], [0], [0, 0, 1, 0], [], []>} : vector<8x8xbf16>, vector<8x8xbf16>, vector<8x8xf32> -> vector<8x8xf32>
    %cst_3 = arith.constant -1.000000e+30 : f32
    %13 = vector.broadcast %cst_3 : f32 to vector<8x8xf32>
    %14 = arith.select %4, %13, %12 : vector<8x8xi1>, vector<8x8xf32>
    %cst_4 = arith.constant dense<0xFF800000> : vector<8xf32>
    %15 = vector.multi_reduction <maximumf>, %14, %cst_4 [1] : vector<8x8xf32> to vector<8xf32>
    %16 = vector.shape_cast %15 : vector<8xf32> to vector<8x1xf32>
    %17 = vector.broadcast %16 : vector<8x1xf32> to vector<8x8xf32>
    %18 = arith.subf %14, %17 : vector<8x8xf32>
    %19 = math.exp %18 : vector<8x8xf32>
    %cst_5 = arith.constant dense<0.000000e+00> : vector<8xf32>
    %20 = vector.multi_reduction <add>, %19, %cst_5 [1] : vector<8x8xf32> to vector<8xf32>
    %21 = vector.shape_cast %20 : vector<8xf32> to vector<8x1xf32>
    %22 = arith.truncf %19 : vector<8x8xf32> to vector<8x8xbf16>
    %cst_6 = arith.constant dense<0.000000e+00> : vector<8x8xf32>
    %23 = tpu.matmul %22, %11, %cst_6 {dimension_numbers = #tpu.dot_dimension_numbers<[1], [0], [0], [1], [0, 0, 1, 1], [], []>} : vector<8x8xbf16>, vector<8x8xbf16>, vector<8x8xf32> -> vector<8x8xf32>
    %24 = tpu.reciprocal %21 {approx = true} : vector<8x1xf32> -> vector<8x1xf32>
    %25 = vector.broadcast %24 : vector<8x1xf32> to vector<8x8xf32>
    %26 = arith.mulf %23, %25 : vector<8x8xf32>
    %27 = vector.extract_strided_slice %1 {offsets = [0, 8], sizes = [8, 8], strides = [1, 1]} : vector<8x96xbf16> to vector<8x8xbf16>
    %28 = arith.extf %27 : vector<8x8xbf16> to vector<8x8xf32>
    %cst_7 = arith.constant 0.353553385 : f32
    %29 = vector.broadcast %cst_7 : f32 to vector<8x8xf32>
    %30 = arith.mulf %28, %29 : vector<8x8xf32>
    %31 = arith.truncf %30 : vector<8x8xf32> to vector<8x8xbf16>
    %32 = vector.extract_strided_slice %1 {offsets = [0, 40], sizes = [8, 8], strides = [1, 1]} : vector<8x96xbf16> to vector<8x8xbf16>
    %33 = vector.extract_strided_slice %1 {offsets = [0, 72], sizes = [8, 8], strides = [1, 1]} : vector<8x96xbf16> to vector<8x8xbf16>
    %cst_8 = arith.constant dense<0.000000e+00> : vector<8x8xf32>
    %34 = tpu.matmul %31, %32, %cst_8 {dimension_numbers = #tpu.dot_dimension_numbers<[1], [1], [0], [0], [0, 0, 1, 0], [], []>} : vector<8x8xbf16>, vector<8x8xbf16>, vector<8x8xf32> -> vector<8x8xf32>
    %cst_9 = arith.constant -1.000000e+30 : f32
    %35 = vector.broadcast %cst_9 : f32 to vector<8x8xf32>
    %36 = arith.select %4, %35, %34 : vector<8x8xi1>, vector<8x8xf32>
    %cst_10 = arith.constant dense<0xFF800000> : vector<8xf32>
    %37 = vector.multi_reduction <maximumf>, %36, %cst_10 [1] : vector<8x8xf32> to vector<8xf32>
    %38 = vector.shape_cast %37 : vector<8xf32> to vector<8x1xf32>
    %39 = vector.broadcast %38 : vector<8x1xf32> to vector<8x8xf32>
    %40 = arith.subf %36, %39 : vector<8x8xf32>
    %41 = math.exp %40 : vector<8x8xf32>
    %cst_11 = arith.constant dense<0.000000e+00> : vector<8xf32>
    %42 = vector.multi_reduction <add>, %41, %cst_11 [1] : vector<8x8xf32> to vector<8xf32>
    %43 = vector.shape_cast %42 : vector<8xf32> to vector<8x1xf32>
    %44 = arith.truncf %41 : vector<8x8xf32> to vector<8x8xbf16>
    %cst_12 = arith.constant dense<0.000000e+00> : vector<8x8xf32>
    %45 = tpu.matmul %44, %33, %cst_12 {dimension_numbers = #tpu.dot_dimension_numbers<[1], [0], [0], [1], [0, 0, 1, 1], [], []>} : vector<8x8xbf16>, vector<8x8xbf16>, vector<8x8xf32> -> vector<8x8xf32>
    %46 = tpu.reciprocal %43 {approx = true} : vector<8x1xf32> -> vector<8x1xf32>
    %47 = vector.broadcast %46 : vector<8x1xf32> to vector<8x8xf32>
    %48 = arith.mulf %45, %47 : vector<8x8xf32>
    %49 = vector.extract_strided_slice %1 {offsets = [0, 16], sizes = [8, 8], strides = [1, 1]} : vector<8x96xbf16> to vector<8x8xbf16>
    %50 = arith.extf %49 : vector<8x8xbf16> to vector<8x8xf32>
    %cst_13 = arith.constant 0.353553385 : f32
    %51 = vector.broadcast %cst_13 : f32 to vector<8x8xf32>
    %52 = arith.mulf %50, %51 : vector<8x8xf32>
    %53 = arith.truncf %52 : vector<8x8xf32> to vector<8x8xbf16>
    %54 = vector.extract_strided_slice %1 {offsets = [0, 48], sizes = [8, 8], strides = [1, 1]} : vector<8x96xbf16> to vector<8x8xbf16>
    %55 = vector.extract_strided_slice %1 {offsets = [0, 80], sizes = [8, 8], strides = [1, 1]} : vector<8x96xbf16> to vector<8x8xbf16>
    %cst_14 = arith.constant dense<0.000000e+00> : vector<8x8xf32>
    %56 = tpu.matmul %53, %54, %cst_14 {dimension_numbers = #tpu.dot_dimension_numbers<[1], [1], [0], [0], [0, 0, 1, 0], [], []>} : vector<8x8xbf16>, vector<8x8xbf16>, vector<8x8xf32> -> vector<8x8xf32>
    %cst_15 = arith.constant -1.000000e+30 : f32
    %57 = vector.broadcast %cst_15 : f32 to vector<8x8xf32>
    %58 = arith.select %4, %57, %56 : vector<8x8xi1>, vector<8x8xf32>
    %cst_16 = arith.constant dense<0xFF800000> : vector<8xf32>
    %59 = vector.multi_reduction <maximumf>, %58, %cst_16 [1] : vector<8x8xf32> to vector<8xf32>
    %60 = vector.shape_cast %59 : vector<8xf32> to vector<8x1xf32>
    %61 = vector.broadcast %60 : vector<8x1xf32> to vector<8x8xf32>
    %62 = arith.subf %58, %61 : vector<8x8xf32>
    %63 = math.exp %62 : vector<8x8xf32>
    %cst_17 = arith.constant dense<0.000000e+00> : vector<8xf32>
    %64 = vector.multi_reduction <add>, %63, %cst_17 [1] : vector<8x8xf32> to vector<8xf32>
    %65 = vector.shape_cast %64 : vector<8xf32> to vector<8x1xf32>
    %66 = arith.truncf %63 : vector<8x8xf32> to vector<8x8xbf16>
    %cst_18 = arith.constant dense<0.000000e+00> : vector<8x8xf32>
    %67 = tpu.matmul %66, %55, %cst_18 {dimension_numbers = #tpu.dot_dimension_numbers<[1], [0], [0], [1], [0, 0, 1, 1], [], []>} : vector<8x8xbf16>, vector<8x8xbf16>, vector<8x8xf32> -> vector<8x8xf32>
    %68 = tpu.reciprocal %65 {approx = true} : vector<8x1xf32> -> vector<8x1xf32>
    %69 = vector.broadcast %68 : vector<8x1xf32> to vector<8x8xf32>
    %70 = arith.mulf %67, %69 : vector<8x8xf32>
    %71 = vector.extract_strided_slice %1 {offsets = [0, 24], sizes = [8, 8], strides = [1, 1]} : vector<8x96xbf16> to vector<8x8xbf16>
    %72 = arith.extf %71 : vector<8x8xbf16> to vector<8x8xf32>
    %cst_19 = arith.constant 0.353553385 : f32
    %73 = vector.broadcast %cst_19 : f32 to vector<8x8xf32>
    %74 = arith.mulf %72, %73 : vector<8x8xf32>
    %75 = arith.truncf %74 : vector<8x8xf32> to vector<8x8xbf16>
    %76 = vector.extract_strided_slice %1 {offsets = [0, 56], sizes = [8, 8], strides = [1, 1]} : vector<8x96xbf16> to vector<8x8xbf16>
    %77 = vector.extract_strided_slice %1 {offsets = [0, 88], sizes = [8, 8], strides = [1, 1]} : vector<8x96xbf16> to vector<8x8xbf16>
    %cst_20 = arith.constant dense<0.000000e+00> : vector<8x8xf32>
    %78 = tpu.matmul %75, %76, %cst_20 {dimension_numbers = #tpu.dot_dimension_numbers<[1], [1], [0], [0], [0, 0, 1, 0], [], []>} : vector<8x8xbf16>, vector<8x8xbf16>, vector<8x8xf32> -> vector<8x8xf32>
    %cst_21 = arith.constant -1.000000e+30 : f32
    %79 = vector.broadcast %cst_21 : f32 to vector<8x8xf32>
    %80 = arith.select %4, %79, %78 : vector<8x8xi1>, vector<8x8xf32>
    %cst_22 = arith.constant dense<0xFF800000> : vector<8xf32>
    %81 = vector.multi_reduction <maximumf>, %80, %cst_22 [1] : vector<8x8xf32> to vector<8xf32>
    %82 = vector.shape_cast %81 : vector<8xf32> to vector<8x1xf32>
    %83 = vector.broadcast %82 : vector<8x1xf32> to vector<8x8xf32>
    %84 = arith.subf %80, %83 : vector<8x8xf32>
    %85 = math.exp %84 : vector<8x8xf32>
    %cst_23 = arith.constant dense<0.000000e+00> : vector<8xf32>
    %86 = vector.multi_reduction <add>, %85, %cst_23 [1] : vector<8x8xf32> to vector<8xf32>
    %87 = vector.shape_cast %86 : vector<8xf32> to vector<8x1xf32>
    %88 = arith.truncf %85 : vector<8x8xf32> to vector<8x8xbf16>
    %cst_24 = arith.constant dense<0.000000e+00> : vector<8x8xf32>
    %89 = tpu.matmul %88, %77, %cst_24 {dimension_numbers = #tpu.dot_dimension_numbers<[1], [0], [0], [1], [0, 0, 1, 1], [], []>} : vector<8x8xbf16>, vector<8x8xbf16>, vector<8x8xf32> -> vector<8x8xf32>
    %90 = tpu.reciprocal %87 {approx = true} : vector<8x1xf32> -> vector<8x1xf32>
    %91 = vector.broadcast %90 : vector<8x1xf32> to vector<8x8xf32>
    %92 = arith.mulf %89, %91 : vector<8x8xf32>
    %93 = tpu.concatenate %26, %48, %70, %92 in 1 : vector<8x8xf32>, vector<8x8xf32>, vector<8x8xf32>, vector<8x8xf32> -> vector<8x32xf32>
    %94 = arith.truncf %93 : vector<8x32xf32> to vector<8x32xbf16>
    %c0_25 = arith.constant 0 : index
    %c0_26 = arith.constant 0 : index
    %c0_27 = arith.constant 0 : index
    %95 = vector.load %arg2[%c0_25, %c0_26, %c0_27] : memref<1x8x32xbf16, #tpu.memory_space<vmem>>, vector<1x8x32xbf16>
    %96 = vector.shape_cast %95 : vector<1x8x32xbf16> to vector<8x32xbf16>
    %97 = vector.shape_cast %94 : vector<8x32xbf16> to vector<1x8x32xbf16>
    tpu.vector_store %arg2[%c0_25, %c0_26, %c0_27], %97 {strides = array<i32>} : memref<1x8x32xbf16, #tpu.memory_space<vmem>>, vector<1x8x32xbf16>,
    return
  }
  func.func @transform_0(%arg0: i32) -> (i32, i32, i32) {
    %c0_i32 = arith.constant 0 : i32
    %c0_i32_0 = arith.constant 0 : i32
    %c0_i32_1 = arith.constant 0 : i32
    return %arg0, %c0_i32, %c0_i32_0 : i32, i32, i32
  }
  func.func @transform_1(%arg0: i32) -> (i32, i32, i32) {
    %c0_i32 = arith.constant 0 : i32
    %c0_i32_0 = arith.constant 0 : i32
    %c0_i32_1 = arith.constant 0 : i32
    return %arg0, %c0_i32, %c0_i32_0 : i32, i32, i32
  }
}

module attributes {stable_mosaic.version = 11 : i64} {
  func.func @kernel(%arg0: i32, %arg1: i32, %arg2: memref<16x32xbf16, #tpu.memory_space<vmem>>, %arg3: memref<32x32xbf16, #tpu.memory_space<vmem>>, %arg4: memref<1x32xf32, #tpu.memory_space<vmem>>, %arg5: memref<16x32xbf16, #tpu.memory_space<vmem>>, %arg6: memref<16x32xbf16, #tpu.memory_space<vmem>>) attributes {dimension_semantics = [#tpu.dimension_semantics<parallel>, #tpu.dimension_semantics<parallel>], iteration_bounds = array<i64: 1, 1>, scalar_prefetch = 0 : i64, scratch_operands = 0 : i64, tpu.core_type = #tpu.core_type<tc>, window_params = [{transform_indices = @transform_0, window_bounds = array<i64: 16, 32>}, {transform_indices = @transform_1, window_bounds = array<i64: 32, 32>}, {transform_indices = @transform_2, window_bounds = array<i64: 1, 32>}, {transform_indices = @transform_3, window_bounds = array<i64: 16, 32>}, {transform_indices = @transform_4, window_bounds = array<i64: 16, 32>}]} {
    %c0 = arith.constant 0 : index
    %c0_0 = arith.constant 0 : index
    %0 = vector.load %arg2[%c0, %c0_0] : memref<16x32xbf16, #tpu.memory_space<vmem>>, vector<16x32xbf16>
    %c0_1 = arith.constant 0 : index
    %c0_2 = arith.constant 0 : index
    %1 = vector.load %arg3[%c0_1, %c0_2] : memref<32x32xbf16, #tpu.memory_space<vmem>>, vector<32x32xbf16>
    %cst = arith.constant dense<0.000000e+00> : vector<16x32xf32>
    %2 = tpu.matmul %0, %1, %cst {dimension_numbers = #tpu.dot_dimension_numbers<[1], [0], [0], [1], [0, 0, 1, 1], [], []>} : vector<16x32xbf16>, vector<32x32xbf16>, vector<16x32xf32> -> vector<16x32xf32>
    %c0_3 = arith.constant 0 : index
    %c0_4 = arith.constant 0 : index
    %3 = vector.load %arg4[%c0_3, %c0_4] : memref<1x32xf32, #tpu.memory_space<vmem>>, vector<1x32xf32>
    %4 = vector.broadcast %3 : vector<1x32xf32> to vector<16x32xf32>
    %5 = arith.addf %2, %4 : vector<16x32xf32>
    %c0_5 = arith.constant 0 : index
    %c0_6 = arith.constant 0 : index
    %6 = vector.load %arg5[%c0_5, %c0_6] : memref<16x32xbf16, #tpu.memory_space<vmem>>, vector<16x32xbf16>
    %7 = arith.extf %6 : vector<16x32xbf16> to vector<16x32xf32>
    %8 = arith.addf %5, %7 : vector<16x32xf32>
    %9 = arith.truncf %8 : vector<16x32xf32> to vector<16x32xbf16>
    %c0_7 = arith.constant 0 : index
    %c0_8 = arith.constant 0 : index
    %10 = vector.load %arg6[%c0_7, %c0_8] : memref<16x32xbf16, #tpu.memory_space<vmem>>, vector<16x32xbf16>
    tpu.vector_store %arg6[%c0_7, %c0_8], %9 {strides = array<i32>} : memref<16x32xbf16, #tpu.memory_space<vmem>>, vector<16x32xbf16>,
    return
  }
  func.func @transform_0(%arg0: i32, %arg1: i32) -> (i32, i32) {
    %c0_i32 = arith.constant 0 : i32
    %c0_i32_0 = arith.constant 0 : i32
    return %arg0, %c0_i32 : i32, i32
  }
  func.func @transform_1(%arg0: i32, %arg1: i32) -> (i32, i32) {
    %c0_i32 = arith.constant 0 : i32
    %c0_i32_0 = arith.constant 0 : i32
    return %c0_i32, %arg1 : i32, i32
  }
  func.func @transform_2(%arg0: i32, %arg1: i32) -> (i32, i32) {
    %c0_i32 = arith.constant 0 : i32
    %c0_i32_0 = arith.constant 0 : i32
    return %c0_i32, %arg1 : i32, i32
  }
  func.func @transform_3(%arg0: i32, %arg1: i32) -> (i32, i32) {
    %c0_i32 = arith.constant 0 : i32
    return %arg0, %arg1 : i32, i32
  }
  func.func @transform_4(%arg0: i32, %arg1: i32) -> (i32, i32) {
    %c0_i32 = arith.constant 0 : i32
    return %arg0, %arg1 : i32, i32
  }
}

module attributes {stable_mosaic.version = 11 : i64} {
  func.func @kernel(%arg0: i32, %arg1: i32, %arg2: memref<16x32xbf16, #tpu.memory_space<vmem>>, %arg3: memref<32x128xbf16, #tpu.memory_space<vmem>>, %arg4: memref<1x128xf32, #tpu.memory_space<vmem>>, %arg5: memref<1x32xf32, #tpu.memory_space<vmem>>, %arg6: memref<1x32xf32, #tpu.memory_space<vmem>>, %arg7: memref<16x128xbf16, #tpu.memory_space<vmem>>) attributes {dimension_semantics = [#tpu.dimension_semantics<parallel>, #tpu.dimension_semantics<parallel>], iteration_bounds = array<i64: 1, 1>, scalar_prefetch = 0 : i64, scratch_operands = 0 : i64, tpu.core_type = #tpu.core_type<tc>, window_params = [{transform_indices = @transform_0, window_bounds = array<i64: 16, 32>}, {transform_indices = @transform_1, window_bounds = array<i64: 32, 128>}, {transform_indices = @transform_2, window_bounds = array<i64: 1, 128>}, {pipeline_mode = #tpu.pipeline_mode<synchronous>, transform_indices = @transform_3, window_bounds = array<i64: 1, 32>}, {pipeline_mode = #tpu.pipeline_mode<synchronous>, transform_indices = @transform_4, window_bounds = array<i64: 1, 32>}, {transform_indices = @transform_5, window_bounds = array<i64: 16, 128>}]} {
    %c0 = arith.constant 0 : index
    %c0_0 = arith.constant 0 : index
    %0 = vector.load %arg2[%c0, %c0_0] : memref<16x32xbf16, #tpu.memory_space<vmem>>, vector<16x32xbf16>
    %1 = arith.extf %0 : vector<16x32xbf16> to vector<16x32xf32>
    %cst = arith.constant dense<0.000000e+00> : vector<16xf32>
    %2 = vector.multi_reduction <add>, %1, %cst [1] : vector<16x32xf32> to vector<16xf32>
    %3 = vector.shape_cast %2 : vector<16xf32> to vector<16x1xf32>
    %cst_1 = arith.constant 3.200000e+01 : f32
    %4 = vector.broadcast %cst_1 : f32 to vector<16x1xf32>
    %5 = arith.divf %3, %4 : vector<16x1xf32>
    %6 = vector.broadcast %5 : vector<16x1xf32> to vector<16x32xf32>
    %7 = arith.subf %1, %6 : vector<16x32xf32>
    %8 = arith.mulf %7, %7 : vector<16x32xf32>
    %cst_2 = arith.constant dense<0.000000e+00> : vector<16xf32>
    %9 = vector.multi_reduction <add>, %8, %cst_2 [1] : vector<16x32xf32> to vector<16xf32>
    %10 = vector.shape_cast %9 : vector<16xf32> to vector<16x1xf32>
    %cst_3 = arith.constant 3.200000e+01 : f32
    %11 = vector.broadcast %cst_3 : f32 to vector<16x1xf32>
    %12 = arith.divf %10, %11 : vector<16x1xf32>
    %c0_4 = arith.constant 0 : index
    %c0_5 = arith.constant 0 : index
    %13 = vector.load %arg5[%c0_4, %c0_5] : memref<1x32xf32, #tpu.memory_space<vmem>>, vector<1x32xf32>
    %14 = vector.broadcast %5 : vector<16x1xf32> to vector<16x32xf32>
    %15 = arith.subf %1, %14 : vector<16x32xf32>
    %cst_6 = arith.constant 9.99999974E-6 : f32
    %16 = vector.broadcast %cst_6 : f32 to vector<16x1xf32>
    %17 = arith.addf %12, %16 : vector<16x1xf32>
    %18 = math.rsqrt %17 : vector<16x1xf32>
    %19 = vector.broadcast %18 : vector<16x1xf32> to vector<16x32xf32>
    %20 = arith.mulf %15, %19 : vector<16x32xf32>
    %21 = vector.broadcast %13 : vector<1x32xf32> to vector<16x32xf32>
    %22 = arith.mulf %21, %20 : vector<16x32xf32>
    %c0_7 = arith.constant 0 : index
    %c0_8 = arith.constant 0 : index
    %23 = vector.load %arg6[%c0_7, %c0_8] : memref<1x32xf32, #tpu.memory_space<vmem>>, vector<1x32xf32>
    %24 = vector.broadcast %23 : vector<1x32xf32> to vector<16x32xf32>
    %25 = arith.addf %22, %24 : vector<16x32xf32>
    %26 = arith.truncf %25 : vector<16x32xf32> to vector<16x32xbf16>
    %c0_9 = arith.constant 0 : index
    %c0_10 = arith.constant 0 : index
    %27 = vector.load %arg3[%c0_9, %c0_10] : memref<32x128xbf16, #tpu.memory_space<vmem>>, vector<32x128xbf16>
    %cst_11 = arith.constant dense<0.000000e+00> : vector<16x128xf32>
    %28 = tpu.matmul %26, %27, %cst_11 {dimension_numbers = #tpu.dot_dimension_numbers<[1], [0], [0], [1], [0, 0, 1, 1], [], []>} : vector<16x32xbf16>, vector<32x128xbf16>, vector<16x128xf32> -> vector<16x128xf32>
    %c0_12 = arith.constant 0 : index
    %c0_13 = arith.constant 0 : index
    %29 = vector.load %arg4[%c0_12, %c0_13] : memref<1x128xf32, #tpu.memory_space<vmem>>, vector<1x128xf32>
    %30 = vector.broadcast %29 : vector<1x128xf32> to vector<16x128xf32>
    %31 = arith.addf %28, %30 : vector<16x128xf32>
    %cst_14 = arith.constant 5.000000e-01 : f32
    %32 = vector.broadcast %cst_14 : f32 to vector<16x128xf32>
    %33 = arith.mulf %32, %31 : vector<16x128xf32>
    %cst_15 = arith.constant 4.471500e-02 : f32
    %34 = vector.broadcast %cst_15 : f32 to vector<16x128xf32>
    %35 = arith.mulf %34, %31 : vector<16x128xf32>
    %36 = arith.mulf %35, %31 : vector<16x128xf32>
    %37 = arith.mulf %36, %31 : vector<16x128xf32>
    %38 = arith.addf %31, %37 : vector<16x128xf32>
    %cst_16 = arith.constant 0.797884583 : f32
    %39 = vector.broadcast %cst_16 : f32 to vector<16x128xf32>
    %40 = arith.mulf %39, %38 : vector<16x128xf32>
    %41 = math.tanh %40 : vector<16x128xf32>
    %cst_17 = arith.constant 1.000000e+00 : f32
    %42 = vector.broadcast %cst_17 : f32 to vector<16x128xf32>
    %43 = arith.addf %42, %41 : vector<16x128xf32>
    %44 = arith.mulf %33, %43 : vector<16x128xf32>
    %45 = arith.truncf %44 : vector<16x128xf32> to vector<16x128xbf16>
    %c0_18 = arith.constant 0 : index
    %c0_19 = arith.constant 0 : index
    %46 = vector.load %arg7[%c0_18, %c0_19] : memref<16x128xbf16, #tpu.memory_space<vmem>>, vector<16x128xbf16>
    tpu.vector_store %arg7[%c0_18, %c0_19], %45 {strides = array<i32>} : memref<16x128xbf16, #tpu.memory_space<vmem>>, vector<16x128xbf16>,
    return
  }
  func.func @transform_0(%arg0: i32, %arg1: i32) -> (i32, i32) {
    %c0_i32 = arith.constant 0 : i32
    %c0_i32_0 = arith.constant 0 : i32
    return %arg0, %c0_i32 : i32, i32
  }
  func.func @transform_1(%arg0: i32, %arg1: i32) -> (i32, i32) {
    %c0_i32 = arith.constant 0 : i32
    %c0_i32_0 = arith.constant 0 : i32
    return %c0_i32, %arg1 : i32, i32
  }
  func.func @transform_2(%arg0: i32, %arg1: i32) -> (i32, i32) {
    %c0_i32 = arith.constant 0 : i32
    %c0_i32_0 = arith.constant 0 : i32
    return %c0_i32, %arg1 : i32, i32
  }
  func.func @transform_3(%arg0: i32, %arg1: i32) -> (i32, i32) {
    %c0_i32 = arith.constant 0 : i32
    %c0_i32_0 = arith.constant 0 : i32
    %c0_i32_1 = arith.constant 0 : i32
    return %c0_i32, %c0_i32_0 : i32, i32
  }
  func.func @transform_4(%arg0: i32, %arg1: i32) -> (i32, i32) {
    %c0_i32 = arith.constant 0 : i32
    %c0_i32_0 = arith.constant 0 : i32
    %c0_i32_1 = arith.constant 0 : i32
    return %c0_i32, %c0_i32_0 : i32, i32
  }
  func.func @transform_5(%arg0: i32, %arg1: i32) -> (i32, i32) {
    %c0_i32 = arith.constant 0 : i32
    return %arg0, %arg1 : i32, i32
  }
}

module attributes {stable_mosaic.version = 11 : i64} {
  func.func @kernel(%arg0: i32, %arg1: i32, %arg2: memref<16x128xbf16, #tpu.memory_space<vmem>>, %arg3: memref<128x32xbf16, #tpu.memory_space<vmem>>, %arg4: memref<1x32xf32, #tpu.memory_space<vmem>>, %arg5: memref<16x32xbf16, #tpu.memory_space<vmem>>, %arg6: memref<16x32xbf16, #tpu.memory_space<vmem>>) attributes {dimension_semantics = [#tpu.dimension_semantics<parallel>, #tpu.dimension_semantics<parallel>], iteration_bounds = array<i64: 1, 1>, scalar_prefetch = 0 : i64, scratch_operands = 0 : i64, tpu.core_type = #tpu.core_type<tc>, window_params = [{transform_indices = @transform_0, window_bounds = array<i64: 16, 128>}, {transform_indices = @transform_1, window_bounds = array<i64: 128, 32>}, {transform_indices = @transform_2, window_bounds = array<i64: 1, 32>}, {transform_indices = @transform_3, window_bounds = array<i64: 16, 32>}, {transform_indices = @transform_4, window_bounds = array<i64: 16, 32>}]} {
    %c0 = arith.constant 0 : index
    %c0_0 = arith.constant 0 : index
    %0 = vector.load %arg2[%c0, %c0_0] : memref<16x128xbf16, #tpu.memory_space<vmem>>, vector<16x128xbf16>
    %c0_1 = arith.constant 0 : index
    %c0_2 = arith.constant 0 : index
    %1 = vector.load %arg3[%c0_1, %c0_2] : memref<128x32xbf16, #tpu.memory_space<vmem>>, vector<128x32xbf16>
    %cst = arith.constant dense<0.000000e+00> : vector<16x32xf32>
    %2 = tpu.matmul %0, %1, %cst {dimension_numbers = #tpu.dot_dimension_numbers<[1], [0], [0], [1], [0, 0, 1, 1], [], []>} : vector<16x128xbf16>, vector<128x32xbf16>, vector<16x32xf32> -> vector<16x32xf32>
    %c0_3 = arith.constant 0 : index
    %c0_4 = arith.constant 0 : index
    %3 = vector.load %arg4[%c0_3, %c0_4] : memref<1x32xf32, #tpu.memory_space<vmem>>, vector<1x32xf32>
    %4 = vector.broadcast %3 : vector<1x32xf32> to vector<16x32xf32>
    %5 = arith.addf %2, %4 : vector<16x32xf32>
    %c0_5 = arith.constant 0 : index
    %c0_6 = arith.constant 0 : index
    %6 = vector.load %arg5[%c0_5, %c0_6] : memref<16x32xbf16, #tpu.memory_space<vmem>>, vector<16x32xbf16>
    %7 = arith.extf %6 : vector<16x32xbf16> to vector<16x32xf32>
    %8 = arith.addf %5, %7 : vector<16x32xf32>
    %9 = arith.truncf %8 : vector<16x32xf32> to vector<16x32xbf16>
    %c0_7 = arith.constant 0 : index
    %c0_8 = arith.constant 0 : index
    %10 = vector.load %arg6[%c0_7, %c0_8] : memref<16x32xbf16, #tpu.memory_space<vmem>>, vector<16x32xbf16>
    tpu.vector_store %arg6[%c0_7, %c0_8], %9 {strides = array<i32>} : memref<16x32xbf16, #tpu.memory_space<vmem>>, vector<16x32xbf16>,
    return
  }
  func.func @transform_0(%arg0: i32, %arg1: i32) -> (i32, i32) {
    %c0_i32 = arith.constant 0 : i32
    %c0_i32_0 = arith.constant 0 : i32
    return %arg0, %c0_i32 : i32, i32
  }
  func.func @transform_1(%arg0: i32, %arg1: i32) -> (i32, i32) {
    %c0_i32 = arith.constant 0 : i32
    %c0_i32_0 = arith.constant 0 : i32
    return %c0_i32, %arg1 : i32, i32
  }
  func.func @transform_2(%arg0: i32, %arg1: i32) -> (i32, i32) {
    %c0_i32 = arith.constant 0 : i32
    %c0_i32_0 = arith.constant 0 : i32
    return %c0_i32, %arg1 : i32, i32
  }
  func.func @transform_3(%arg0: i32, %arg1: i32) -> (i32, i32) {
    %c0_i32 = arith.constant 0 : i32
    return %arg0, %arg1 : i32, i32
  }
  func.func @transform_4(%arg0: i32, %arg1: i32) -> (i32, i32) {
    %c0_i32 = arith.constant 0 : i32
    return %arg0, %arg1 : i32, i32
  }
}

module attributes {stable_mosaic.version = 11 : i64} {
  func.func @kernel(%arg0: i32, %arg1: i32, %arg2: memref<16x32xbf16, #tpu.memory_space<vmem>>, %arg3: memref<32x128xbf16, #tpu.memory_space<vmem>>, %arg4: memref<1x128xf32, #tpu.memory_space<vmem>>, %arg5: memref<1x32xf32, #tpu.memory_space<vmem>>, %arg6: memref<1x32xf32, #tpu.memory_space<vmem>>, %arg7: memref<16x128xf32, #tpu.memory_space<vmem>>) attributes {dimension_semantics = [#tpu.dimension_semantics<parallel>, #tpu.dimension_semantics<parallel>], iteration_bounds = array<i64: 1, 1>, scalar_prefetch = 0 : i64, scratch_operands = 0 : i64, tpu.core_type = #tpu.core_type<tc>, window_params = [{transform_indices = @transform_0, window_bounds = array<i64: 16, 32>}, {transform_indices = @transform_1, window_bounds = array<i64: 32, 128>}, {transform_indices = @transform_2, window_bounds = array<i64: 1, 128>}, {pipeline_mode = #tpu.pipeline_mode<synchronous>, transform_indices = @transform_3, window_bounds = array<i64: 1, 32>}, {pipeline_mode = #tpu.pipeline_mode<synchronous>, transform_indices = @transform_4, window_bounds = array<i64: 1, 32>}, {transform_indices = @transform_5, window_bounds = array<i64: 16, 128>}]} {
    %c0 = arith.constant 0 : index
    %c0_0 = arith.constant 0 : index
    %0 = vector.load %arg2[%c0, %c0_0] : memref<16x32xbf16, #tpu.memory_space<vmem>>, vector<16x32xbf16>
    %1 = arith.extf %0 : vector<16x32xbf16> to vector<16x32xf32>
    %cst = arith.constant dense<0.000000e+00> : vector<16xf32>
    %2 = vector.multi_reduction <add>, %1, %cst [1] : vector<16x32xf32> to vector<16xf32>
    %3 = vector.shape_cast %2 : vector<16xf32> to vector<16x1xf32>
    %cst_1 = arith.constant 3.200000e+01 : f32
    %4 = vector.broadcast %cst_1 : f32 to vector<16x1xf32>
    %5 = arith.divf %3, %4 : vector<16x1xf32>
    %6 = vector.broadcast %5 : vector<16x1xf32> to vector<16x32xf32>
    %7 = arith.subf %1, %6 : vector<16x32xf32>
    %8 = arith.mulf %7, %7 : vector<16x32xf32>
    %cst_2 = arith.constant dense<0.000000e+00> : vector<16xf32>
    %9 = vector.multi_reduction <add>, %8, %cst_2 [1] : vector<16x32xf32> to vector<16xf32>
    %10 = vector.shape_cast %9 : vector<16xf32> to vector<16x1xf32>
    %cst_3 = arith.constant 3.200000e+01 : f32
    %11 = vector.broadcast %cst_3 : f32 to vector<16x1xf32>
    %12 = arith.divf %10, %11 : vector<16x1xf32>
    %c0_4 = arith.constant 0 : index
    %c0_5 = arith.constant 0 : index
    %13 = vector.load %arg5[%c0_4, %c0_5] : memref<1x32xf32, #tpu.memory_space<vmem>>, vector<1x32xf32>
    %14 = vector.broadcast %5 : vector<16x1xf32> to vector<16x32xf32>
    %15 = arith.subf %1, %14 : vector<16x32xf32>
    %cst_6 = arith.constant 9.99999974E-6 : f32
    %16 = vector.broadcast %cst_6 : f32 to vector<16x1xf32>
    %17 = arith.addf %12, %16 : vector<16x1xf32>
    %18 = math.rsqrt %17 : vector<16x1xf32>
    %19 = vector.broadcast %18 : vector<16x1xf32> to vector<16x32xf32>
    %20 = arith.mulf %15, %19 : vector<16x32xf32>
    %21 = vector.broadcast %13 : vector<1x32xf32> to vector<16x32xf32>
    %22 = arith.mulf %21, %20 : vector<16x32xf32>
    %c0_7 = arith.constant 0 : index
    %c0_8 = arith.constant 0 : index
    %23 = vector.load %arg6[%c0_7, %c0_8] : memref<1x32xf32, #tpu.memory_space<vmem>>, vector<1x32xf32>
    %24 = vector.broadcast %23 : vector<1x32xf32> to vector<16x32xf32>
    %25 = arith.addf %22, %24 : vector<16x32xf32>
    %26 = arith.truncf %25 : vector<16x32xf32> to vector<16x32xbf16>
    %c0_9 = arith.constant 0 : index
    %c0_10 = arith.constant 0 : index
    %27 = vector.load %arg3[%c0_9, %c0_10] : memref<32x128xbf16, #tpu.memory_space<vmem>>, vector<32x128xbf16>
    %cst_11 = arith.constant dense<0.000000e+00> : vector<16x128xf32>
    %28 = tpu.matmul %26, %27, %cst_11 {dimension_numbers = #tpu.dot_dimension_numbers<[1], [0], [0], [1], [0, 0, 1, 1], [], []>} : vector<16x32xbf16>, vector<32x128xbf16>, vector<16x128xf32> -> vector<16x128xf32>
    %c0_12 = arith.constant 0 : index
    %c0_13 = arith.constant 0 : index
    %29 = vector.load %arg4[%c0_12, %c0_13] : memref<1x128xf32, #tpu.memory_space<vmem>>, vector<1x128xf32>
    %30 = vector.broadcast %29 : vector<1x128xf32> to vector<16x128xf32>
    %31 = arith.addf %28, %30 : vector<16x128xf32>
    %c0_14 = arith.constant 0 : index
    %c0_15 = arith.constant 0 : index
    %32 = vector.load %arg7[%c0_14, %c0_15] : memref<16x128xf32, #tpu.memory_space<vmem>>, vector<16x128xf32>
    tpu.vector_store %arg7[%c0_14, %c0_15], %31 {strides = array<i32>} : memref<16x128xf32, #tpu.memory_space<vmem>>, vector<16x128xf32>,
    return
  }
  func.func @transform_0(%arg0: i32, %arg1: i32) -> (i32, i32) {
    %c0_i32 = arith.constant 0 : i32
    %c0_i32_0 = arith.constant 0 : i32
    return %arg0, %c0_i32 : i32, i32
  }
  func.func @transform_1(%arg0: i32, %arg1: i32) -> (i32, i32) {
    %c0_i32 = arith.constant 0 : i32
    %c0_i32_0 = arith.constant 0 : i32
    return %c0_i32, %arg1 : i32, i32
  }
  func.func @transform_2(%arg0: i32, %arg1: i32) -> (i32, i32) {
    %c0_i32 = arith.constant 0 : i32
    %c0_i32_0 = arith.constant 0 : i32
    return %c0_i32, %arg1 : i32, i32
  }
  func.func @transform_3(%arg0: i32, %arg1: i32) -> (i32, i32) {
    %c0_i32 = arith.constant 0 : i32
    %c0_i32_0 = arith.constant 0 : i32
    %c0_i32_1 = arith.constant 0 : i32
    return %c0_i32, %c0_i32_0 : i32, i32
  }
  func.func @transform_4(%arg0: i32, %arg1: i32) -> (i32, i32) {
    %c0_i32 = arith.constant 0 : i32
    %c0_i32_0 = arith.constant 0 : i32
    %c0_i32_1 = arith.constant 0 : i32
    return %c0_i32, %c0_i32_0 : i32, i32
  }
  func.func @transform_5(%arg0: i32, %arg1: i32) -> (i32, i32) {
    %c0_i32 = arith.constant 0 : i32
    return %arg0, %arg1 : i32, i32
  }
}

</mosaic_0001>

<bundles_post_ra>
// kernel: gpt2_forward.13
= control target key start
LH: loop header
LB: loop body
LE: loop exit
PB: predicated region body
PF: predicated region fallthrough
CT: control target
= control target key end

     0   :  { %v143_v0 = vmov 0.0   ;;  %vm144_vm0 = vmmov 0   ;;  %vm48_vm1 = vcmask 261120   ;;  %vm107_vm2 = vcmask 257024   ;;  %s191_s1 = inlined_call_operand.vmem [shape: bf16[32,32], index: 1, kind: input, shape index: {}]   ;;  %s192_s0 = inlined_call_operand.vmem [shape: bf16[16,32], index: 0, kind: input, shape index: {}]   ;;  %s193_s3 = inlined_call_operand.vmem [shape: bf16[16,32], index: 3, kind: input, shape index: {}]   ;;  %s194_s2 = inlined_call_operand.vmem [shape: f32[1,32], index: 2, kind: input, shape index: {}]   ;;  %s195_s4 = inlined_call_operand.vmem [shape: bf16[16,32], index: 4, kind: output, shape index: {}]  }
   0x1   :  { %130 = vmatprep.subr.bf16.mxu0 %v143_v0  ;;  %v140_v1 = vld [vmem:[%s191_s1] sm:$0xff]   ;;  %134 = vmatprep.mubr.msk.bf16.mxu0 %vm144_vm0, %v143_v0  ;;  %v141_v2 = vld [vmem:[%s191_s1 + $0x8] sm:$0xff]  }
   0x2   :  { %131 = vmatpush3.bf16.msra.mxu0 %v140_v1  ;;  %v142_v3 = vld [vmem:[%s192_s0] sm:$0xff]  }
   0x3   :  { %132 = vmatprep.subr.bf16.mxu0 %v143_v0  ;;  %v124_v4 = vld [vmem:[%s193_s3] sm:$0xff]  }
   0x4   :  { %v114_v5 = vld [vmem:[%s194_s2] ss:$0 sm:$0xff]  ;;  %v125_v6 = vunpack.c.l.bf16 %v124_v4  ;;  %v126_v10 = vunpack.c.h.bf16 %v124_v4 }
   0x6   :  { %133 = vmatpush3.bf16.msra.mxu0 %v141_v2 }
   0x9   :  { %135 = vmatmul.mubr.msk.bf16.vlgmr.msra.gmra.mrb[0].mxu0 %vm48_vm1, %v142_v3 }
  0xdc   :  { %v86_v7 = vpop.f32.mrb[0].mxu0 }
  0xdd   :  { %v87_v8 = vadd.f32 %v114_v5, %v86_v7  ;;  %v136_v9 = vpop.f32.mrb[1].mxu0 }
  0xde   :  { %v89_v11 = vpop.f32.mrb[2].mxu0 }
  0xdf   :  { %v97_v12 = vadd.f32 %v125_v6, %v87_v8  ;;  %v90_v13 = vadd.f32 %v114_v5, %v89_v11  ;;  %v137_v14 = vpop.f32.mrb[3].mxu0 }
  0xe1   :  { %v121_v15 = vpack.c.bf16 %v97_v12, %v97_v12  ;;  %v98_v16 = vadd.f32 %v126_v10, %v90_v13 }
  0xe3   :  { %108 = vst.msk [vmem:[%s195_s4] sm:$0xf] %vm107_vm2, %v121_v15  ;;  %v122_v17 = vpack.c.bf16 %v98_v16, %v98_v16 }
  0xe5   :  { %109 = vst.msk [vmem:[%s195_s4 + $0x4] sm:$0xf] %vm107_vm2, %v122_v17 }

// kernel: gpt2_forward.11
= control target key start
LH: loop header
LB: loop body
LE: loop exit
PB: predicated region body
PF: predicated region fallthrough
CT: control target
= control target key end

     0   :  { %vm25_vm0 = vcmask 261120   ;;  %v187_v16 = vmov 0.0   ;;  %vm188_vm1 = vmmov 0   ;;  %vm147_vm2 = vcmask 781312   ;;  %s248_s0 = inlined_call_operand.vmem [shape: bf16[16,32], index: 0, kind: input, shape index: {}]   ;;  %s249_s1 = inlined_call_operand.vmem [shape: bf16[32,96], index: 1, kind: input, shape index: {}]   ;;  %s250_s3 = inlined_call_operand.vmem [shape: f32[1,32], index: 3, kind: input, shape index: {}]   ;;  %s251_s4 = inlined_call_operand.vmem [shape: f32[1,32], index: 4, kind: input, shape index: {}]   ;;  %s252_s2 = inlined_call_operand.vmem [shape: f32[1,96], index: 2, kind: input, shape index: {}]   ;;  %s253_s5 = inlined_call_operand.vmem [shape: bf16[16,96], index: 5, kind: output, shape index: {}]  }
   0x1   :  { %v165_v0 = vld [vmem:[%s248_s0] sm:$0xff]   ;;  %171 = vmatprep.subr.bf16.mxu0 %v187_v16  ;;  %v182_v17 = vld [vmem:[%s249_s1 + $0x8] sm:$0xff]   ;;  %175 = vmatprep.mubr.msk.bf16.mxu0 %vm188_vm1, %v187_v16 }
   0x2   :  { %v166_v1 = vunpack.c.l.bf16 %v165_v0  ;;  %v167_v2 = vunpack.c.h.bf16 %v165_v0  ;;  %v181_v15 = vld [vmem:[%s249_s1] sm:$0xff]  }
   0x3   :  { %172 = vmatpush3.bf16.msra.mxu0 %v181_v15  ;;  %v154_v26 = vld [vmem:[%s250_s3] ss:$0 sm:$0xff] }
   0x4   :  { %v26_v3 = vsel %vm25_vm0, %v166_v1, 0.0  ;;  %v29_v4 = vsel %vm25_vm0, %v167_v2, 0.0  ;;  %173 = vmatprep.subr.bf16.mxu0 %v187_v16  ;;  %v155_v30 = vld [vmem:[%s251_s4] ss:$0 sm:$0xff] }
   0x5   :  { %27 = vadd.xlane.f32.xlu0 %v26_v3  ;;  %v156_v35 = vld [vmem:[%s252_s2] ss:$0 sm:$0xff] }
   0x7   :  { %174 = vmatpush3.bf16.msra.mxu0 %v182_v17 }
   0x9   :  { %30 = vadd.xlane.f32.xlu0 %v29_v4 }
  0x92   :  { %v28_v5 = vpop.xlane.xlu0 %27 }
  0x93   :  { %v33_v6 = vmul.f32 0.03125, %v28_v5 }
  0x95   :  { %v35_v7 = vsub.f32 %v166_v1, %v33_v6 }
  0x96   :  { %v31_v8 = vpop.xlane.xlu0 %30 }
  0x97   :  { %v34_v9 = vmul.f32 0.03125, %v31_v8  ;;  %v37_v10 = vmul.f32 %v35_v7, %v35_v7 }
  0x99   :  { %v36_v11 = vsub.f32 %v167_v2, %v34_v9  ;;  %v39_v12 = vsel %vm25_vm0, %v37_v10, 0.0 }
  0x9a   :  { %40 = vadd.xlane.f32.xlu1 %v39_v12 }
  0x9b   :  { %v38_v13 = vmul.f32 %v36_v11, %v36_v11 }
  0x9d   :  { %v42_v14 = vsel %vm25_vm0, %v38_v13, 0.0 }
  0x9e   :  { %43 = vadd.xlane.f32.xlu1 %v42_v14 }
 0x127   :  { %v41_v18 = vpop.xlane.xlu1 %40 }
 0x128   :  { %v45_v19 = vmul.f32 0.03125, %v41_v18 }
 0x12a   :  { %v48_v20 = vadd.f32 1e-05, %v45_v19 }
 0x12b   :  { %v44_v21 = vpop.xlane.xlu1 %43 }
 0x12c   :  { %183 = vrsqrt.f32 %v48_v20  ;;  %v46_v22 = vmul.f32 0.03125, %v44_v21 }
 0x12e   :  { %v49_v23 = vadd.f32 1e-05, %v46_v22 }
 0x130   :  { %185 = vrsqrt.f32 %v49_v23 }
 0x136   :  { %v184_v24 = vpop.eup %183 }
 0x137   :  { %v52_v25 = vmul.f32 %v184_v24, %v35_v7 }
 0x139   :  { %v60_v29 = vmul.f32 %v154_v26, %v52_v25 }
 0x13a   :  { %v186_v27 = vpop.eup %185 }
 0x13b   :  { %v53_v28 = vmul.f32 %v186_v27, %v36_v11  ;;  %v69_v32 = vadd.f32 %v155_v30, %v60_v29 }
 0x13d   :  { %v61_v31 = vmul.f32 %v154_v26, %v53_v28 }
 0x13f   :  { %v70_v33 = vadd.f32 %v155_v30, %v61_v31 }
 0x141   :  { %v71_v34 = vpack.c.bf16 %v70_v33, %v69_v32 }
 0x143   :  { %176 = vmatmul.mubr.msk.bf16.vlgmr.msra.gmra.mrb[0].mxu0 %vm25_vm0, %v71_v34 }
 0x216   :  { %v132_v36 = vpop.f32.mrb[0].mxu0 }
 0x217   :  { %v133_v37 = vadd.f32 %v156_v35, %v132_v36  ;;  %v177_v38 = vpop.f32.mrb[1].mxu0 }
 0x218   :  { %v135_v39 = vpop.f32.mrb[2].mxu0 }
 0x219   :  { %v162_v40 = vpack.c.bf16 %v133_v37, %v133_v37  ;;  %v136_v41 = vadd.f32 %v156_v35, %v135_v39  ;;  %v178_v42 = vpop.f32.mrb[3].mxu0 }
 0x21b   :  { %148 = vst.msk [vmem:[%s253_s5] sm:$0xf] %vm147_vm2, %v162_v40  ;;  %v163_v43 = vpack.c.bf16 %v136_v41, %v136_v41 }
 0x21d   :  { %149 = vst.msk [vmem:[%s253_s5 + $0x4] sm:$0xf] %vm147_vm2, %v163_v43 }

// kernel: gpt2_forward.14
= control target key start
LH: loop header
LB: loop body
LE: loop exit
PB: predicated region body
PF: predicated region fallthrough
CT: control target
= control target key end

     0   :  { %vm25_vm0 = vcmask 261120   ;;  %v213_v16 = vmov 0.0   ;;  %vm214_vm1 = vmmov 0   ;;  %s271_s0 = inlined_call_operand.vmem [shape: bf16[16,32], index: 0, kind: input, shape index: {}]   ;;  %s272_s1 = inlined_call_operand.vmem [shape: bf16[32,128], index: 1, kind: input, shape index: {}]   ;;  %s273_s3 = inlined_call_operand.vmem [shape: f32[1,32], index: 3, kind: input, shape index: {}]   ;;  %s274_s4 = inlined_call_operand.vmem [shape: f32[1,32], index: 4, kind: input, shape index: {}]   ;;  %s275_s2 = inlined_call_operand.vmem [shape: f32[1,128], index: 2, kind: input, shape index: {}]   ;;  %s276_s5 = inlined_call_operand.vmem [shape: bf16[16,128], index: 5, kind: output, shape index: {}]  }
   0x1   :  { %v182_v0 = vld [vmem:[%s271_s0] sm:$0xff]   ;;  %193 = vmatprep.subr.bf16.mxu0 %v213_v16  ;;  %v204_v17 = vld [vmem:[%s272_s1 + $0x8] sm:$0xff]   ;;  %197 = vmatprep.mubr.msk.bf16.mxu0 %vm214_vm1, %v213_v16 }
   0x2   :  { %v183_v1 = vunpack.c.l.bf16 %v182_v0  ;;  %v184_v2 = vunpack.c.h.bf16 %v182_v0  ;;  %v203_v15 = vld [vmem:[%s272_s1] sm:$0xff]  }
   0x3   :  { %194 = vmatpush3.bf16.msra.mxu0 %v203_v15  ;;  %v171_v26 = vld [vmem:[%s273_s3] ss:$0 sm:$0xff] }
   0x4   :  { %v26_v3 = vsel %vm25_vm0, %v183_v1, 0.0  ;;  %v29_v4 = vsel %vm25_vm0, %v184_v2, 0.0  ;;  %195 = vmatprep.subr.bf16.mxu0 %v213_v16  ;;  %v172_v30 = vld [vmem:[%s274_s4] ss:$0 sm:$0xff] }
   0x5   :  { %27 = vadd.xlane.f32.xlu0 %v26_v3  ;;  %v173_v35 = vld [vmem:[%s275_s2] ss:$0 sm:$0xff] }
   0x7   :  { %196 = vmatpush3.bf16.msra.mxu0 %v204_v17 }
   0x9   :  { %30 = vadd.xlane.f32.xlu0 %v29_v4 }
  0x92   :  { %v28_v5 = vpop.xlane.xlu0 %27 }
  0x93   :  { %v33_v6 = vmul.f32 0.03125, %v28_v5 }
  0x95   :  { %v35_v7 = vsub.f32 %v183_v1, %v33_v6 }
  0x96   :  { %v31_v8 = vpop.xlane.xlu0 %30 }
  0x97   :  { %v34_v9 = vmul.f32 0.03125, %v31_v8  ;;  %v37_v10 = vmul.f32 %v35_v7, %v35_v7 }
  0x99   :  { %v36_v11 = vsub.f32 %v184_v2, %v34_v9  ;;  %v39_v12 = vsel %vm25_vm0, %v37_v10, 0.0 }
  0x9a   :  { %40 = vadd.xlane.f32.xlu1 %v39_v12 }
  0x9b   :  { %v38_v13 = vmul.f32 %v36_v11, %v36_v11 }
  0x9d   :  { %v42_v14 = vsel %vm25_vm0, %v38_v13, 0.0 }
  0x9e   :  { %43 = vadd.xlane.f32.xlu1 %v42_v14 }
 0x127   :  { %v41_v18 = vpop.xlane.xlu1 %40 }
 0x128   :  { %v45_v19 = vmul.f32 0.03125, %v41_v18 }
 0x12a   :  { %v48_v20 = vadd.f32 1e-05, %v45_v19 }
 0x12b   :  { %v44_v21 = vpop.xlane.xlu1 %43 }
 0x12c   :  { %205 = vrsqrt.f32 %v48_v20  ;;  %v46_v22 = vmul.f32 0.03125, %v44_v21 }
 0x12e   :  { %v49_v23 = vadd.f32 1e-05, %v46_v22 }
 0x130   :  { %207 = vrsqrt.f32 %v49_v23 }
 0x136   :  { %v206_v24 = vpop.eup %205 }
 0x137   :  { %v52_v25 = vmul.f32 %v206_v24, %v35_v7 }
 0x139   :  { %v60_v29 = vmul.f32 %v171_v26, %v52_v25 }
 0x13a   :  { %v208_v27 = vpop.eup %207 }
 0x13b   :  { %v53_v28 = vmul.f32 %v208_v27, %v36_v11  ;;  %v69_v32 = vadd.f32 %v172_v30, %v60_v29 }
 0x13d   :  { %v61_v31 = vmul.f32 %v171_v26, %v53_v28 }
 0x13f   :  { %v70_v33 = vadd.f32 %v172_v30, %v61_v31 }
 0x141   :  { %v71_v34 = vpack.c.bf16 %v70_v33, %v69_v32 }
 0x143   :  { %198 = vmatmul.mubr.msk.bf16.vlgmr.msra.gmra.mrb[0].mxu0 %vm25_vm0, %v71_v34 }
 0x216   :  { %v132_v36 = vpop.f32.mrb[0].mxu0 }
 0x217   :  { %v133_v37 = vadd.f32 %v173_v35, %v132_v36  ;;  %v199_v38 = vpop.f32.mrb[1].mxu0 }
 0x218   :  { %v135_v39 = vpop.f32.mrb[2].mxu0 }
 0x219   :  { %v141_v40 = vmul.f32 0.044715, %v133_v37  ;;  %v136_v41 = vadd.f32 %v173_v35, %v135_v39  ;;  %v200_v42 = vpop.f32.mrb[3].mxu0  ;;  %v139_v55 = vmul.f32 0.5, %v133_v37 }
 0x21b   :  { %v143_v43 = vmul.f32 %v141_v40, %v133_v37  ;;  %v142_v44 = vmul.f32 0.044715, %v136_v41  ;;  %v140_v56 = vmul.f32 0.5, %v136_v41 }
 0x21d   :  { %v145_v45 = vmul.f32 %v143_v43, %v133_v37  ;;  %v144_v46 = vmul.f32 %v142_v44, %v136_v41 }
 0x21f   :  { %v147_v47 = vadd.f32 %v145_v45, %v133_v37  ;;  %v146_v48 = vmul.f32 %v144_v46, %v136_v41 }
 0x221   :  { %v149_v49 = vmul.f32 0.7978846, %v147_v47  ;;  %v148_v50 = vadd.f32 %v146_v48, %v136_v41 }
 0x223   :  { %209 = vtanh.f32 %v149_v49  ;;  %v150_v51 = vmul.f32 0.7978846, %v148_v50 }
 0x225   :  { %211 = vtanh.f32 %v150_v51 }
 0x22d   :  { %v210_v52 = vpop.eup %209 }
 0x22e   :  { %v153_v53 = vadd.f32 1.0, %v210_v52 }
 0x22f   :  { %v212_v54 = vpop.eup %211 }
 0x230   :  { %v154_v57 = vadd.f32 1.0, %v212_v54  ;;  %v155_v58 = vmul.f32 %v153_v53, %v139_v55 }
 0x232   :  { %v156_v59 = vmul.f32 %v154_v57, %v140_v56 }
 0x234   :  { %v188_v60 = vpack.c.bf16 %v156_v59, %v155_v58 }
 0x236   :  { %189 = vst [vmem:[%s276_s5] sm:$0xff] %v188_v60  }

// kernel: gpt2_forward.12
= control target key start
LH: loop header
LB: loop body
LE: loop exit
PB: predicated region body
PF: predicated region fallthrough
CT: control target
= control target key end

     0   :  { %s800_s6 = smov 0   ;;  %s909_s0 = inlined_call_operand.vmem [shape: bf16[2,8,96], index: 0, kind: input, shape index: {}]   ;;  %s910_s1 = inlined_call_operand.vmem [shape: bf16[2,8,32], index: 1, kind: output, shape index: {}]  }
   0x1 LB: > { %s643_s7 = sadd.s32 4294967295, %s772_s6   ;;  %p647_p0 = scmp.ge.s32.totalorder %s772_s6, 1  ;;  %s772_s6 = sphi %s800_s6, %s11_s6  }
   0x2   : > { %p86_p1 = scmp.lt.s32.totalorder %s772_s6, 3 }
   0x4   : > { %p87_p2 = pnand %p647_p0, %p86_p1 }
   0x5   : > { %p104_p3 = scmp.lt.s32.totalorder (!%p87_p2), %s643_s7, 1  ;;  %v774_v0 = vmov (!%p87_p2), 0.0   ;;  %vm775_vm0 = vmmov (!%p87_p2), 0   ;;  %s776_s12 = smov (!%p87_p2), 96   ;;  %vm127_vm1 = vcmask (!%p87_p2), 64512   ;;  %v114_v8 = vlaneseq (!%p87_p2) }
   0x6   : > { %90 = sbr.rel (%p87_p2) target bundleno = 1245 (0x4dd), region = 24  ;;  %677 = vmatprep.subr.bf16.mxu0 (!%p87_p2), %v774_v0  ;;  %679 = vmatprep.mubr.msk.bf16.mxu0 (!%p87_p2), %vm775_vm0, %v774_v0  ;;  %s777_s13 = smov (!%p87_p2), 64   ;;  %vm190_vm3 = vcmask (!%p87_p2), 1043456   ;;  %vm583_vm4 = vcmask (!%p87_p2), 130048   ;;  %vm585_vm5 = vcmask (!%p87_p2), 195584   ;;  %vm588_vm6 = vcmask (!%p87_p2), 257024  }
   0x7   : > { %683 = vmatprep.subr.bf16.mxu1 (!%p87_p2), %v774_v0  ;;  %685 = vmatprep.mubr.msk.bf16.mxu1 (!%p87_p2), %vm775_vm0, %v774_v0  ;;  %s778_s14 = smov (!%p87_p2), 88   ;;  %s779_s15 = smov (!%p87_p2), 120   ;;  %v834_v9 = vshrl.u32 (!%p87_p2), %v114_v8, 7  ;;  %v836_v10 = vand.u32 (!%p87_p2), 127, %v114_v8 }
   0x8   : > { %s780_s16 = smov (!%p87_p2), 80   ;;  %s781_s17 = smov (!%p87_p2), 112  }
   0x9   : > { %s782_s18 = smov (!%p87_p2), 72   ;;  %s783_s19 = smov (!%p87_p2), 104   ;;  %vm118_vm2 = vcmp.gt.s32.totalorder (!%p87_p2), %v836_v10, %v834_v9 }
   0xa   : > { %s784_s20 = smov (!%p87_p2), 56   ;;  %s785_s21 = smov (!%p87_p2), 48  }
   0xb   : > { %s786_s22 = smov (!%p87_p2), 40   ;;  %s787_s23 = smov (!%p87_p2), 8  }
   0xc   : > { %s788_s24 = smov (!%p87_p2), 16   ;;  %s789_s25 = smov (!%p87_p2), 24  }
   0xd   : > { %s912_s7 = smov (!%p104_p3, %s643_s7), 1 }
   0xe   : > { %s648_s8 = sshll.u32 %s912_s7, 2 }
   0xf   : > { %s107_s11 = scalar_lea.vmem %s909_s0, %s648_s8  ;;  %s111_s28 = scalar_lea.vmem %s910_s1, %s648_s8 }
  0x10   : > { %v113_v1 = vld [vmem:[%s107_s11] sm:$0xf] }
  0x11   : > { %v822_v2 = vcombine.low %v113_v1, %v113_v1  ;;  %v119_v3 = vunpack.c.l.bf16 %v113_v1 }
  0x13   : > { %125 = vrot.lane.b32.xlu0 %v822_v2, %s776_s12  ;;  %v120_v6 = vmul.f32 0.35355338, %v119_v3  ;;  %185 = vrot.lane.b32.xlu1 %v822_v2, %s777_s13 }
  0x15   : > { %v121_v7 = vpack.c.bf16 %v120_v6, %v120_v6 }
  0x17   : > { %239 = vrot.lane.b32.xlu1 %v822_v2, %s778_s14 }
  0x1b   : > { %237 = vrot.lane.b32.xlu1 %v121_v7, %s779_s15 }
  0x1f   : > { %350 = vrot.lane.b32.xlu1 %v822_v2, %s780_s16 }
  0x23   : > { %348 = vrot.lane.b32.xlu1 %v121_v7, %s781_s17 }
  0x27   : > { %461 = vrot.lane.b32.xlu1 %v822_v2, %s782_s18 }
  0x2b   : > { %459 = vrot.lane.b32.xlu1 %v121_v7, %s783_s19 }
  0x85   : > { %v126_v4 = vpop.permute.xlu0 %125  ;;  %v186_v17 = vpop.permute.xlu1 %185 }
  0x86   : > { %v132_v5 = vsel %vm127_vm1, %v126_v4, 0  ;;  %v192_v18 = vsel %vm190_vm3, %v186_v17, 0 }
  0x87   : > { %678 = vmatpush3.bf16.xpose.msra.mxu0 %v132_v5  ;;  %684 = vmatpush3.bf16.msra.mxu1 %v192_v18 }
  0x88   : > { %695 = vmatprep.subr.bf16.mxu0 %v774_v0  ;;  %689 = vmatprep.subr.bf16.mxu1 %v774_v0 }
  0x89   : > { %v240_v22 = vpop.permute.xlu1 %239 }
  0x8a   : > { %v245_v25 = vsel %vm127_vm1, %v240_v22, 0 }
  0x8d   : > { %v238_v23 = vpop.permute.xlu1 %237 }
  0x8e   : > { %680 = vmatmul.mubr.msk.bf16.vlgmr.msra.gmra.mrb[0].mxu0 %vm127_vm1, %v121_v7 }
  0x8f   : > { %697 = vmatprep.mubr.msk.bf16.mxu0 %vm775_vm0, %v774_v0 }
  0x91   : > { %v351_v27 = vpop.permute.xlu1 %350 }
  0x92   : > { %v356_v29 = vsel %vm127_vm1, %v351_v27, 0 }
  0x95   : > { %v349_v28 = vpop.permute.xlu1 %348 }
  0x99   : > { %v462_v30 = vpop.permute.xlu1 %461 }
  0x9a   : > { %v467_v31 = vsel %vm127_vm1, %v462_v30, 0 }
  0x9d   : > { %v460_v32 = vpop.permute.xlu1 %459 }
 0x161   : > { %v168_v11 = vpop.f32.mrb[0].mxu0 }
 0x162   : > { %v174_v12 = vsel %vm118_vm2, -1e+30, %v168_v11  ;;  %v681_v13 = vpop.f32.mrb[1].mxu0 }
 0x163   : > { %v171_v14 = vpop.f32.mrb[2].mxu0  ;;  %v175_v15 = vsel %vm127_vm1, %v174_v12, -inf }
 0x164   : > { %176 = vmax.xlane.f32.xlu0 %v175_v15  ;;  %v682_v16 = vpop.f32.mrb[3].mxu0 }
 0x17a   : > { %298 = vrot.lane.b32.xlu0 %v822_v2, %s784_s20 }
 0x1f1   : > { %v177_v19 = vpop.xlane.xlu0 %176 }
 0x1f2   : > { %v178_v20 = vsub.f32 %v174_v12, %v177_v19 }
 0x1f4   : > { %v179_v21 = vmul.f32 1.442695, %v178_v20 }
 0x1f5   : > { %v299_v33 = vpop.permute.xlu0 %298 }
 0x1f6   : > { %750 = vpow2.f32 %v179_v21  ;;  %v304_v34 = vsel %vm190_vm3, %v299_v33, 0 }
 0x1f7   : > { %696 = vmatpush3.bf16.msra.mxu0 %v304_v34 }
 0x1f8   : > { %707 = vmatprep.subr.bf16.mxu0 %v774_v0 }
 0x200   : > { %v847_v24 = vpop.eup %750 }
 0x201   : > { %v184_v26 = vpack.c.bf16 %v847_v24, %v847_v24  ;;  %v181_v16 = vsel %vm127_vm1, %v847_v24, 0.0 }
 0x203   : > { %686 = vmatmul.mubr.msk.bf16.vlgmr.msra.gmra.mrb[0].mxu1 %vm127_vm1, %v184_v26 }
 0x204   : > { %690 = vmatpush3.bf16.xpose.msra.mxu1 %v245_v25  ;;  %691 = vmatprep.mubr.msk.bf16.mxu1 %vm775_vm0, %v774_v0 }
 0x205   : > { %701 = vmatprep.subr.bf16.mxu1 %v774_v0 }
 0x20b   : > { %692 = vmatmul.mubr.msk.bf16.vlgmr.msra.gmra.mrb[4].mxu1 %vm127_vm1, %v238_v23 }
 0x20c   : > { %702 = vmatpush3.bf16.xpose.msra.mxu1 %v356_v29  ;;  %703 = vmatprep.mubr.msk.bf16.mxu1 %vm775_vm0, %v774_v0 }
 0x20d   : > { %713 = vmatprep.subr.bf16.mxu1 %v774_v0 }
 0x213   : > { %704 = vmatmul.mubr.msk.bf16.vlgmr.msra.gmra.mrb[8].mxu1 %vm127_vm1, %v349_v28 }
 0x214   : > { %714 = vmatpush3.bf16.xpose.msra.mxu1 %v467_v31  ;;  %715 = vmatprep.mubr.msk.bf16.mxu1 %vm775_vm0, %v774_v0 }
 0x21b   : > { %716 = vmatmul.mubr.msk.bf16.vlgmr.msra.gmra.mrb[12].mxu1 %vm127_vm1, %v460_v32 }
 0x2d6   : > { %v868_v35 = vpop.f32.mrb[0].mxu1 }
 0x2d7   : > { %v687_v36 = vpop.f32.mrb[1].mxu1 }
 0x2d8   : > { %v231_v37 = vpop.f32.mrb[2].mxu1 }
 0x2d9   : > { %v688_v38 = vpop.f32.mrb[3].mxu1 }
 0x2de   : > { %v281_v39 = vpop.f32.mrb[4].mxu1 }
 0x2df   : > { %v287_v40 = vsel %vm118_vm2, -1e+30, %v281_v39  ;;  %v693_v41 = vpop.f32.mrb[5].mxu1 }
 0x2e0   : > { %v284_v42 = vpop.f32.mrb[6].mxu1  ;;  %v288_v43 = vsel %vm127_vm1, %v287_v40, -inf }
 0x2e1   : > { %289 = vmax.xlane.f32.xlu1 %v288_v43  ;;  %v694_v44 = vpop.f32.mrb[7].mxu1 }
 0x2e6   : > { %v392_v45 = vpop.f32.mrb[8].mxu1 }
 0x2e7   : > { %v398_v46 = vsel %vm118_vm2, -1e+30, %v392_v45  ;;  %v705_v47 = vpop.f32.mrb[9].mxu1 }
 0x2e8   : > { %v395_v48 = vpop.f32.mrb[10].mxu1  ;;  %v399_v49 = vsel %vm127_vm1, %v398_v46, -inf }
 0x2e9   : > { %400 = vmax.xlane.f32.xlu0 %v399_v49  ;;  %v706_v50 = vpop.f32.mrb[11].mxu1 }
 0x2ee   : > { %v503_v51 = vpop.f32.mrb[12].mxu1 }
 0x2ef   : > { %v509_v52 = vsel %vm118_vm2, -1e+30, %v503_v51  ;;  %v717_v53 = vpop.f32.mrb[13].mxu1 }
 0x2f0   : > { %v506_v54 = vpop.f32.mrb[14].mxu1  ;;  %v510_v55 = vsel %vm127_vm1, %v509_v52, -inf }
 0x2f1   : > { %511 = vmax.xlane.f32.xlu0 %v510_v55  ;;  %v718_v56 = vpop.f32.mrb[15].mxu1 }
 0x2f2   : > { %409 = vrot.lane.b32.xlu1 %v822_v2, %s785_s21 }
 0x307   : > { %520 = vrot.lane.b32.xlu0 %v822_v2, %s786_s22 }
 0x36e   : > { %v290_v57 = vpop.xlane.xlu1 %289 }
 0x36f   : > { %v291_v58 = vsub.f32 %v287_v40, %v290_v57 }
 0x371   : > { %v292_v59 = vmul.f32 1.442695, %v291_v58 }
 0x372   : > { %v410_v63 = vpop.permute.xlu1 %409 }
 0x373   : > { %752 = vpow2.f32 %v292_v59  ;;  %v415_v3 = vsel %vm190_vm3, %v410_v63, 0 }
 0x376   : > { %v401_v60 = vpop.xlane.xlu0 %400 }
 0x377   : > { %v402_v61 = vsub.f32 %v398_v46, %v401_v60 }
 0x379   : > { %v403_v62 = vmul.f32 1.442695, %v402_v61 }
 0x37b   : > { %754 = vpow2.f32 %v403_v62 }
 0x37d   : > { %v753_v1 = vpop.eup %752 }
 0x37e   : > { %v512_v4 = vpop.xlane.xlu0 %511  ;;  %v294_v5 = vsel %vm127_vm1, %v753_v1, 0.0  ;;  %v297_v6 = vpack.c.bf16 %v753_v1, %v753_v1 }
 0x37f   : > { %v513_v7 = vsub.f32 %v509_v52, %v512_v4  ;;  %295 = vadd.xlane.f32.xlu0 %v294_v5 }
 0x380   : > { %698 = vmatmul.mubr.msk.bf16.vlgmr.msra.gmra.mrb[4].mxu0 %vm127_vm1, %v297_v6 }
 0x381   : > { %v514_v2 = vmul.f32 1.442695, %v513_v7  ;;  %708 = vmatpush3.bf16.msra.mxu0 %v415_v3  ;;  %709 = vmatprep.mubr.msk.bf16.mxu0 %vm775_vm0, %v774_v0 }
 0x382   : > { %719 = vmatprep.subr.bf16.mxu0 %v774_v0  ;;  %v521_v8 = vpop.permute.xlu0 %520 }
 0x383   : > { %756 = vpow2.f32 %v514_v2  ;;  %v526_v10 = vsel %vm190_vm3, %v521_v8, 0 }
 0x385   : > { %v755_v9 = vpop.eup %754 }
 0x386   : > { %v405_v11 = vsel %vm127_vm1, %v755_v9, 0.0  ;;  %v408_v12 = vpack.c.bf16 %v755_v9, %v755_v9 }
 0x387   : > { %406 = vadd.xlane.f32.xlu1 %v405_v11 }
 0x388   : > { %710 = vmatmul.mubr.msk.bf16.vlgmr.msra.gmra.mrb[8].mxu0 %vm127_vm1, %v408_v12 }
 0x389   : > { %720 = vmatpush3.bf16.msra.mxu0 %v526_v10  ;;  %721 = vmatprep.mubr.msk.bf16.mxu0 %vm775_vm0, %v774_v0 }
 0x38d   : > { %v757_v13 = vpop.eup %756 }
 0x38e   : > { %v516_v14 = vsel %vm127_vm1, %v757_v13, 0.0  ;;  %v519_v15 = vpack.c.bf16 %v757_v13, %v757_v13 }
 0x38f   : > { %517 = vadd.xlane.f32.xlu0 %v516_v14 }
 0x390   : > { %722 = vmatmul.mubr.msk.bf16.vlgmr.msra.gmra.mrb[12].mxu0 %vm127_vm1, %v519_v15 }
 0x393   : > { %182 = vadd.xlane.f32.xlu0 %v181_v16 }
 0x40c   : > { %v296_v17 = vpop.xlane.xlu0 %295 }
 0x40d   : > { %758 = vrcp.f32 %v296_v17 }
 0x414   : > { %v407_v18 = vpop.xlane.xlu1 %406 }
 0x415   : > { %760 = vrcp.f32 %v407_v18 }
 0x417   : > { %v759_v19 = vpop.eup %758 }
 0x41c   : > { %v518_v23 = vpop.xlane.xlu0 %517 }
 0x41d   : > { %762 = vrcp.f32 %v518_v23 }
 0x41f   : > { %v761_v26 = vpop.eup %760 }
 0x420   : > { %v183_v38 = vpop.xlane.xlu0 %182 }
 0x421   : > { %764 = vrcp.f32 %v183_v38 }
 0x427   : > { %v763_v31 = vpop.eup %762 }
 0x42b   : > { %v765_v39 = vpop.eup %764 }
 0x42c   : > { %v235_v41 = vmul.f32 %v765_v39, %v868_v35 }
 0x453   : > { %v340_v20 = vpop.f32.mrb[4].mxu0 }
 0x454   : > { %v347_v21 = vmul.f32 %v759_v19, %v340_v20  ;;  %v699_v22 = vpop.f32.mrb[5].mxu0 }
 0x455   : > { %v343_v0 = vpop.f32.mrb[6].mxu0 }
 0x456   : > { %571 = vrot.lane.b32.xlu0 %v347_v21, %s787_s23  ;;  %v700_v25 = vpop.f32.mrb[7].mxu0 }
 0x45b   : > { %v451_v27 = vpop.f32.mrb[8].mxu0 }
 0x45c   : > { %v458_v28 = vmul.f32 %v761_v26, %v451_v27  ;;  %v711_v29 = vpop.f32.mrb[9].mxu0 }
 0x45d   : > { %v454_v24 = vpop.f32.mrb[10].mxu0 }
 0x45e   : > { %575 = vrot.lane.b32.xlu1 %v458_v28, %s788_s24  ;;  %v712_v30 = vpop.f32.mrb[11].mxu0 }
 0x463   : > { %v562_v32 = vpop.f32.mrb[12].mxu0 }
 0x464   : > { %v569_v33 = vmul.f32 %v763_v31, %v562_v32  ;;  %v723_v34 = vpop.f32.mrb[13].mxu0 }
 0x465   : > { %v565_v36 = vpop.f32.mrb[14].mxu0 }
 0x466   : > { %579 = vrot.lane.b32.xlu0 %v569_v33, %s789_s25  ;;  %v724_v37 = vpop.f32.mrb[15].mxu0 }
 0x4c8   : > { %v572_v40 = vpop.permute.xlu0 %571 }
 0x4c9   : > { %v582_v43 = vsel %vm127_vm1, %v235_v41, %v572_v40 }
 0x4d0   : > { %v576_v42 = vpop.permute.xlu1 %575 }
 0x4d1   : > { %v584_v44 = vsel %vm583_vm4, %v582_v43, %v576_v42 }
 0x4d8   : > { %v580_v45 = vpop.permute.xlu0 %579 }
 0x4d9   : > { %v586_v46 = vsel %vm585_vm5, %v584_v44, %v580_v45 }
 0x4da   : > { %v587_v47 = vpack.c.bf16 %v586_v46, %v586_v46 }
 0x4dc   : > { %589 = vst.msk [vmem:[%s111_s28] sm:$0xf] %vm588_vm6, %v587_v47 }
 0x4dd PF: > { %s11_s6 = sadd.s32 1, %s772_s6  }
 0x4de   : > { %p8_p4 = scmp.ge.s32.totalorder %s11_s6, 4  }
 0x4e0   :  { %10 = sbr.rel (!%p8_p4) target bundleno = 1 (0x1), region = 54 }

// kernel: gpt2_forward.15
= control target key start
LH: loop header
LB: loop body
LE: loop exit
PB: predicated region body
PF: predicated region fallthrough
CT: control target
= control target key end

     0   :  { %v217_v0 = vmov 0.0   ;;  %vm218_vm0 = vmmov 0   ;;  %vm152_vm1 = vcmask 257024   ;;  %s283_s1 = inlined_call_operand.vmem [shape: bf16[128,32], index: 1, kind: input, shape index: {}]   ;;  %s284_s0 = inlined_call_operand.vmem [shape: bf16[16,128], index: 0, kind: input, shape index: {}]   ;;  %s285_s3 = inlined_call_operand.vmem [shape: bf16[16,32], index: 3, kind: input, shape index: {}]   ;;  %s286_s2 = inlined_call_operand.vmem [shape: f32[1,32], index: 2, kind: input, shape index: {}]   ;;  %s287_s4 = inlined_call_operand.vmem [shape: bf16[16,32], index: 4, kind: output, shape index: {}]  }
   0x1   :  { %186 = vmatprep.subr.bf16.mxu0 %v217_v0  ;;  %v208_v1 = vld [vmem:[%s283_s1] sm:$0xff]   ;;  %202 = vmatprep.mubr.msk.bf16.mxu0 %vm218_vm0, %v217_v0  ;;  %v209_v2 = vld [vmem:[%s283_s1 + $0x8] sm:$0xff]   ;;  %v210_v3 = vld [vmem:[%s283_s1 + $0x10] sm:$0xff]  }
   0x2   :  { %187 = vmatpush3.bf16.msra.mxu0 %v208_v1  ;;  %v211_v4 = vld [vmem:[%s283_s1 + $0x18] sm:$0xff]   ;;  %v212_v5 = vld [vmem:[%s283_s1 + $0x20] sm:$0xff]   ;;  %v213_v6 = vld [vmem:[%s283_s1 + $0x28] sm:$0xff]  }
   0x3   :  { %188 = vmatprep.subr.bf16.mxu0 %v217_v0  ;;  %v214_v7 = vld [vmem:[%s283_s1 + $0x30] sm:$0xff]   ;;  %v215_v8 = vld [vmem:[%s283_s1 + $0x38] sm:$0xff]   ;;  %v216_v9 = vld [vmem:[%s284_s0] sm:$0xff]  }
   0x4   :  { %v174_v10 = vld [vmem:[%s285_s3] sm:$0xff]  }
   0x5   :  { %v159_v11 = vld [vmem:[%s286_s2] ss:$0 sm:$0xff]  ;;  %v175_v12 = vunpack.c.l.bf16 %v174_v10  ;;  %v176_v16 = vunpack.c.h.bf16 %v174_v10 }
   0x6   :  { %189 = vmatpush3.bf16.msra.mxu0 %v209_v2 }
   0x7   :  { %190 = vmatprep.subr.bf16.mxu0 %v217_v0 }
   0xa   :  { %191 = vmatpush3.bf16.msra.mxu0 %v210_v3 }
   0xb   :  { %192 = vmatprep.subr.bf16.mxu0 %v217_v0 }
   0xe   :  { %193 = vmatpush3.bf16.msra.mxu0 %v211_v4 }
   0xf   :  { %194 = vmatprep.subr.bf16.mxu0 %v217_v0 }
  0x12   :  { %195 = vmatpush3.bf16.msra.mxu0 %v212_v5 }
  0x13   :  { %196 = vmatprep.subr.bf16.mxu0 %v217_v0 }
  0x16   :  { %197 = vmatpush3.bf16.msra.mxu0 %v213_v6 }
  0x17   :  { %198 = vmatprep.subr.bf16.mxu0 %v217_v0 }
  0x1a   :  { %199 = vmatpush3.bf16.msra.mxu0 %v214_v7 }
  0x1b   :  { %200 = vmatprep.subr.bf16.mxu0 %v217_v0 }
  0x1e   :  { %201 = vmatpush3.bf16.msra.mxu0 %v215_v8 }
  0x21   :  { %203 = vmatmul.mubr.bf16.vlgmr.msra.gmra.mrb[0].mxu0 %v216_v9 }
  0xf4   :  { %v131_v13 = vpop.f32.mrb[0].mxu0 }
  0xf5   :  { %v132_v14 = vadd.f32 %v159_v11, %v131_v13  ;;  %v204_v15 = vpop.f32.mrb[1].mxu0 }
  0xf6   :  { %v134_v17 = vpop.f32.mrb[2].mxu0 }
  0xf7   :  { %v142_v18 = vadd.f32 %v175_v12, %v132_v14  ;;  %v135_v19 = vadd.f32 %v159_v11, %v134_v17  ;;  %v205_v20 = vpop.f32.mrb[3].mxu0 }
  0xf9   :  { %v171_v21 = vpack.c.bf16 %v142_v18, %v142_v18  ;;  %v143_v22 = vadd.f32 %v176_v16, %v135_v19 }
  0xfb   :  { %153 = vst.msk [vmem:[%s287_s4] sm:$0xf] %vm152_vm1, %v171_v21  ;;  %v172_v23 = vpack.c.bf16 %v143_v22, %v143_v22 }
  0xfd   :  { %154 = vst.msk [vmem:[%s287_s4 + $0x4] sm:$0xf] %vm152_vm1, %v172_v23 }

// kernel: gpt2_forward.21
= control target key start
LH: loop header
LB: loop body
LE: loop exit
PB: predicated region body
PF: predicated region fallthrough
CT: control target
= control target key end

     0   :  { %vm26_vm0 = vcmask 261120   ;;  %s284_s0 = inlined_call_operand.vmem [shape: bf16[16,32], index: 0, kind: input, shape index: {}]   ;;  %s285_s1 = inlined_call_operand.vmem [shape: bf16[32,128], index: 1, kind: input, shape index: {}]   ;;  %s286_s2 = inlined_call_operand.vmem [shape: f32[1,128], index: 2, kind: input, shape index: {}]   ;;  %s287_s3 = inlined_call_operand.vmem [shape: f32[1,32], index: 3, kind: input, shape index: {}]   ;;  %s288_s4 = inlined_call_operand.vmem [shape: f32[1,32], index: 4, kind: input, shape index: {}]   ;;  %s289_s5 = inlined_call_operand.hbm [shape: f32[16,128], index: 5, kind: output, shape index: {}]  }
   0x1   :  { %v165_v0 = vld [vmem:[%s284_s0] sm:$0xff]  }
   0x2   :  { %v166_v1 = vunpack.c.l.bf16 %v165_v0  ;;  %v167_v2 = vunpack.c.h.bf16 %v165_v0 }
   0x3   :  { %10 = vsyncpa [#allocation3], 0  ;;  %v184_v15 = vld [vmem:[%s285_s1] sm:$0xff]   ;;  %v214_v16 = vmov 0.0   ;;  %v185_v17 = vld [vmem:[%s285_s1 + $0x8] sm:$0xff]   ;;  %vm215_vm1 = vmmov 0  }
   0x4   :  { %v27_v3 = vsel %vm26_vm0, %v166_v1, 0.0  ;;  %v30_v4 = vsel %vm26_vm0, %v167_v2, 0.0  ;;  %171 = vmatprep.subr.bf16.mxu0 %v214_v16  ;;  %175 = vmatprep.mubr.msk.bf16.mxu0 %vm215_vm1, %v214_v16  ;;  %v158_v26 = vld [vmem:[%s287_s3] ss:$0 sm:$0xff]  ;;  %s216_s28 = smov [#allocation2]  }
   0x5   :  { %28 = vadd.xlane.f32.xlu0 %v27_v3  ;;  %172 = vmatpush3.bf16.msra.mxu0 %v184_v15  ;;  %v159_v30 = vld [vmem:[%s288_s4] ss:$0 sm:$0xff]  ;;  %s147_s29 = sshll.u32 %s216_s28, 4  ;;  %s148_s29 = int_to_ptr.vmem [resolvable:$true] %s147_s29 }
   0x6   :  { %173 = vmatprep.subr.bf16.mxu0 %v214_v16  ;;  %v160_v35 = vld [vmem:[%s286_s2] ss:$0 sm:$0xff]  ;;  %s190_s3 = scalar_lea.vmem %s148_s29, 256  ;;  %p195_p1 = scmp.lt.s32.totalorder %s148_s29, %s148_s29 }
   0x7   :  { %p191_p0 = scmp.ne.s32.totalorder %s148_s29, %s190_s3  ;;  %p196_p2 = scmp.lt.s32.totalorder %s190_s3, %s190_s3 }
   0x9   :  { %31 = vadd.xlane.f32.xlu0 %v30_v4  ;;  %174 = vmatpush3.bf16.msra.mxu0 %v185_v17  ;;  %p197_p3 = por %p196_p2, %p195_p1 }
   0xb   :  { %p198_p4 = pnand %p197_p3, %p191_p0 }
  0x92   :  { %v29_v5 = vpop.xlane.xlu0 %28 }
  0x93   :  { %v34_v6 = vmul.f32 0.03125, %v29_v5 }
  0x95   :  { %v36_v7 = vsub.f32 %v166_v1, %v34_v6 }
  0x96   :  { %v32_v8 = vpop.xlane.xlu0 %31 }
  0x97   :  { %v35_v9 = vmul.f32 0.03125, %v32_v8  ;;  %v38_v10 = vmul.f32 %v36_v7, %v36_v7 }
  0x99   :  { %v37_v11 = vsub.f32 %v167_v2, %v35_v9  ;;  %v40_v12 = vsel %vm26_vm0, %v38_v10, 0.0 }
  0x9a   :  { %41 = vadd.xlane.f32.xlu1 %v40_v12 }
  0x9b   :  { %v39_v13 = vmul.f32 %v37_v11, %v37_v11 }
  0x9d   :  { %v43_v14 = vsel %vm26_vm0, %v39_v13, 0.0 }
  0x9e   :  { %44 = vadd.xlane.f32.xlu1 %v43_v14 }
 0x127   :  { %v42_v18 = vpop.xlane.xlu1 %41 }
 0x128   :  { %v46_v19 = vmul.f32 0.03125, %v42_v18 }
 0x12a   :  { %v49_v20 = vadd.f32 1e-05, %v46_v19 }
 0x12b   :  { %v45_v21 = vpop.xlane.xlu1 %44 }
 0x12c   :  { %186 = vrsqrt.f32 %v49_v20  ;;  %v47_v22 = vmul.f32 0.03125, %v45_v21 }
 0x12e   :  { %v50_v23 = vadd.f32 1e-05, %v47_v22 }
 0x130   :  { %188 = vrsqrt.f32 %v50_v23 }
 0x136   :  { %v187_v24 = vpop.eup %186 }
 0x137   :  { %v53_v25 = vmul.f32 %v187_v24, %v36_v7 }
 0x139   :  { %v61_v29 = vmul.f32 %v158_v26, %v53_v25 }
 0x13a   :  { %v189_v27 = vpop.eup %188 }
 0x13b   :  { %v54_v28 = vmul.f32 %v189_v27, %v37_v11  ;;  %v70_v32 = vadd.f32 %v159_v30, %v61_v29 }
 0x13d   :  { %v62_v31 = vmul.f32 %v158_v26, %v54_v28 }
 0x13f   :  { %v71_v33 = vadd.f32 %v159_v30, %v62_v31 }
 0x141   :  { %v72_v34 = vpack.c.bf16 %v71_v33, %v70_v32 }
 0x143   :  { %176 = vmatmul.mubr.msk.bf16.vlgmr.msra.gmra.mrb[0].mxu0 %vm26_vm0, %v72_v34 }
 0x216   :  { %v133_v36 = vpop.f32.mrb[0].mxu0 }
 0x217   :  { %v134_v37 = vadd.f32 %v160_v35, %v133_v36  ;;  %v177_v38 = vpop.f32.mrb[1].mxu0 }
 0x218   :  { %v136_v39 = vpop.f32.mrb[2].mxu0 }
 0x219   :  { %140 = vst [vmem:[#allocation2] sm:$0xff] %v134_v37  ;;  %v137_v40 = vadd.f32 %v160_v35, %v136_v39  ;;  %v178_v41 = vpop.f32.mrb[3].mxu0 }
 0x21b   :  { %141 = vst [vmem:[#allocation2 + $0x8] sm:$0xff] %v137_v40 }
 0x21c   :  { %201 = shalt.err (!%p198_p4)
}
 0x21d   :  { %s202_s30 = scalar_lea.hbm %s289_s5, 256 }
 0x21e   :  { %p203_p5 = scmp.ne.s32.totalorder %s289_s5, %s202_s30  ;;  %p206_p6 = scmp.lt.u32.totalorder %s202_s30, %s289_s5 }
 0x220   :  { %p208_p7 = pnand %p206_p6, %p203_p5 }
 0x222   :  { %211 = shalt.err (!%p208_p7)
}
 0x223   :  { %s217_s10 = smov 128   ;;  %s218_s11 = smov 8  }
 0x224   :  { %153 = dma.vmem_to_hbm [thread:$0]  %s148_s29, 256, %s289_s5, [#allocation3], %s217_s10, %s217_s10, %s218_s11  }
 0x225   :  { %212 = dma.done.wait [#allocation3], 256  }
 0x226   :  { %213 = vsyncadd [#allocation3], 4294967040 }
 0x227   :  { %157 = vsyncpa [#allocation3], 1 }

</bundles_post_ra>
